<compile_context>
chip_gen: v7x
topology: tpu7x:2x2x1
jax: 0.10.0
libtpu: 0.0.40
codegen_flags: <defaults>
</compile_context>

<pallas_src>
import functools

import jax
import jax.numpy as jnp
from jax.experimental import pallas as pl
from jax.experimental.pallas import tpu as pltpu


# ----------------------------------------------------------------------------
# Fused kernel (one batch element per grid step)
# ----------------------------------------------------------------------------

def fused_pcn_kernel(pc_ref, grid_ref, w_ref, b_ref, out_ref, *, layout):
    """Encoder + FC + FoldingNet decoder for one batch element.

    pc_ref   : (3, N)    bf16 channels-first point slab for this batch element
    grid_ref : (2, M)    f32 2D folding grid (M folded points on the lane axis)
    w_ref    : (R, 128)  f32 packed transposed-weight slab (static row blocks)
    b_ref    : (R, 1)    f32 packed column-bias slab (same row offsets)
    out_ref  : (3, M)    f32 folded point cloud for this batch element
    layout   : static nested tuple of (row_offset, c_out, c_in) slice specs
    """
    mlp_l, fc_l, f1_cw, f1_pt, f1_rest, f2_cw, f2_pt, f2_rest = layout

    def w_of(e):                       # static slice of the weight slab (free)
        off, co, ci = e
        return w_ref[off:off + co, 0:ci]

    def b_of(e):                       # static slice of the bias slab
        off, co, _ = e
        return b_ref[off:off + co, :]

    def mm_bf16(e, x):                 # bf16 MXU matmul, f32 accumulation
        return jnp.dot(w_of(e).astype(jnp.bfloat16), x.astype(jnp.bfloat16),
                       preferred_element_type=jnp.float32)

    def mm_f32(e, x):                  # f32 matmul for the tiny decoder
        return jnp.dot(w_of(e), x, preferred_element_type=jnp.float32)

    # ---- Encoder: shared point-wise MLP, channels-first (C, N).
    # TODO(synk): ReLU is applied to the final shared-MLP layer before the
    # max-pool (matches the previous implementation); the original
    # pointcloud_encoder source was not provided, so this may need adjusting.
    h = pc_ref[...]                                        # (3, N) bf16
    for e in mlp_l:
        h = jnp.maximum(mm_bf16(e, h) + b_of(e), 0.0)      # (C, N) f32

    # ---- Global max-pool over the points axis (one XLU reduce per batch).
    glob = jnp.max(h, axis=1, keepdims=True)               # (C_enc, 1) f32

    # ---- FC stack on the pooled feature (ReLU on all but the last layer).
    f = glob
    for i, e in enumerate(fc_l):
        f = mm_f32(e, f) + b_of(e)
        if i + 1 < len(fc_l):
            f = jnp.maximum(f, 0.0)
    cw = f                                                 # (F, 1) codeword

    # ---- Folding MLPs.  [codeword ++ points] concat realized as a split
    # matmul: the codeword term is a single matvec per batch element.
    def fold(cw_e, pt_e, rest, pts):
        n_layers = 1 + len(rest)
        cw_term = mm_f32(cw_e, cw) + b_of(cw_e)            # (C, 1)
        h = mm_f32(pt_e, pts) + cw_term                    # (C, M)
        if n_layers > 1:
            h = jnp.maximum(h, 0.0)
        for i, e in enumerate(rest):
            h = mm_f32(e, h) + b_of(e)
            if i + 1 < len(rest):
                h = jnp.maximum(h, 0.0)
        return h                                           # (3, M) f32

    fold1 = fold(f1_cw, f1_pt, f1_rest, grid_ref[...])     # (3, M)
    out_ref[...] = fold(f2_cw, f2_pt, f2_rest, fold1)      # lane-dense store


# ----------------------------------------------------------------------------
# One-time parameter packing (hoisted out of the per-call hot path)
# ----------------------------------------------------------------------------

def _round_up(x, m):
    return (x + m - 1) // m * m


def prepare_params(params):
    """Pack all layer parameters into two slabs + a static slice layout.

    Returns (prepared, layout): `prepared` holds device arrays (weight slab,
    bias slab, folding grid); `layout` is a hashable nested tuple of
    (row_offset, c_out, c_in) static slice specs consumed by the kernel.
    """
    mlp_p, fc_p = params["mlp"], params["fc"]
    fold1_p, fold2_p = params["fold1"], params["fold2"]
    F = fc_p[-1][0].shape[1]                               # codeword width

    placed = []                                            # (off, wT, bcol|None)
    next_off = [0]

    def place(w_t, bcol):
        c_out, c_in = w_t.shape
        off = next_off[0]
        placed.append((off, w_t, bcol))
        next_off[0] = off + _round_up(int(c_out), 8)       # sublane-align rows
        return (off, int(c_out), int(c_in))

    def place_layer(W, b):
        return place(jnp.transpose(W).astype(jnp.float32),
                     jnp.reshape(b, (-1, 1)).astype(jnp.float32))

    mlp_l = tuple(place_layer(W, b) for W, b in mlp_p)
    fc_l = tuple(place_layer(W, b) for W, b in fc_p)

    def place_fold(fold_p):
        W0, b0 = fold_p[0]                                 # (F + d, C) first layer
        cw_e = place_layer(W0[:F], b0)                     # codeword block (+ bias)
        pt_e = place(jnp.transpose(W0[F:]).astype(jnp.float32), None)
        rest = tuple(place_layer(W, b) for W, b in fold_p[1:])
        return cw_e, pt_e, rest

    f1_cw, f1_pt, f1_rest = place_fold(fold1_p)
    f2_cw, f2_pt, f2_rest = place_fold(fold2_p)

    rows = max(_round_up(next_off[0], 8), 8)
    lane_w = _round_up(max(w.shape[1] for _, w, _ in placed), 128)

    w_slab = jnp.zeros((rows, lane_w), jnp.float32)
    b_slab = jnp.zeros((rows, 1), jnp.float32)
    for off, w_t, bcol in placed:
        co, ci = w_t.shape
        w_slab = w_slab.at[off:off + co, :ci].set(w_t)
        if bcol is not None:
            b_slab = b_slab.at[off:off + co, :].set(bcol)

    prepared = {
        "w_slab": w_slab,                                  # (R, lane_w) f32
        "b_slab": b_slab,                                  # (R, 1) f32
        "grid": params["grid"].astype(jnp.float32),        # (2, M) f32
    }
    layout = (mlp_l, fc_l, f1_cw, f1_pt, f1_rest, f2_cw, f2_pt, f2_rest)
    return prepared, layout


# ----------------------------------------------------------------------------
# Wrapper (a single pallas_call per forward)
# ----------------------------------------------------------------------------

@functools.partial(jax.jit, static_argnames=("layout",))
def pcn_foldingnet_forward(pc_b3n, prepared, *, layout):
    """pc_b3n: (B, 3, N) as in the PyTorch module.  Returns (B, 3, M) f32."""
    B, C_in, N = pc_b3n.shape
    grid_pts = prepared["grid"]                            # (2, M)
    w_slab = prepared["w_slab"]                            # (R, lane_w)
    b_slab = prepared["b_slab"]                            # (R, 1)
    M = grid_pts.shape[1]

    # bf16 point cloud halves the dominant HBM read; all accumulation is f32.
    pc = pc_b3n.astype(jnp.bfloat16)

    # One whole (3, N) batch-element slab per grid step; activations are
    # (C_enc, N) f32, so for typical PCN sizes this is at most a few MiB of
    # VMEM on every TPU generation.
    # TODO(synk): re-introduce an N-tiled grid with a running-max scratch if
    # N * C_enc ever approaches the VMEM budget (v7x: 64 MiB physical).
    kern = functools.partial(fused_pcn_kernel, layout=layout)
    return pl.pallas_call(
        kern,
        out_shape=jax.ShapeDtypeStruct((B, 3, M), jnp.float32),
        grid=(B,),
        in_specs=[
            pl.BlockSpec((None, C_in, N), lambda b: (b, 0, 0)),
            pl.BlockSpec(grid_pts.shape, lambda b: (0, 0)),
            pl.BlockSpec(w_slab.shape, lambda b: (0, 0)),
            pl.BlockSpec(b_slab.shape, lambda b: (0, 0)),
        ],
        out_specs=pl.BlockSpec((None, 3, M), lambda b: (b, 0, 0)),
        compiler_params=pltpu.CompilerParams(
            dimension_semantics=("parallel",),
            vmem_limit_bytes=32 * 1024 * 1024),
    )(pc, grid_pts, w_slab, b_slab)


# ----------------------------------------------------------------------------
# Parameter construction (deterministic, in-script)
# ----------------------------------------------------------------------------

def init_linear(key, c_in, c_out):
    kw, kb = jax.random.split(key)
    W = jax.random.normal(kw, (c_in, c_out), jnp.float32) / jnp.sqrt(float(c_in))
    b = 0.01 * jax.random.normal(kb, (1, c_out), jnp.float32)
    return W, b


def init_mlp(key, dims):
    params = []
    for i in range(len(dims) - 1):
        key, sub = jax.random.split(key)
        params.append(init_linear(sub, dims[i], dims[i + 1]))
    return params, key


def build_grid(grid_dims):
    gx = jnp.linspace(-0.5, 0.5, grid_dims[0])
    gy = jnp.linspace(-0.5, 0.5, grid_dims[1])
    xx, yy = jnp.meshgrid(gx, gy, indexing="ij")
    # Channels-first (2, M): the M folded points sit on the lane axis.
    return jnp.stack([xx.ravel(), yy.ravel()], axis=0).astype(jnp.float32)


def build_pcn_foldingnet_params(key, mlp_dims, fc_dims, grid_dims,
                                folding1_dims, folding2_dims,
                                weight1_dims, weight3_dims):
    assert mlp_dims[-1] == fc_dims[0]
    assert folding1_dims[0] == fc_dims[-1] + 2
    assert folding2_dims[0] == fc_dims[-1] + 3

    mlp_p, key = init_mlp(key, mlp_dims)
    fc_p, key = init_mlp(key, fc_dims)
    fold1_p, key = init_mlp(key, folding1_dims)
    fold2_p, key = init_mlp(key, folding2_dims)
    # TODO(synk): the decoder's Weight1/Weight3 branches come from a submodule
    # whose source was not provided; their parameters are initialized
    # deterministically here but are not applied in the forward pass (the
    # PyTorch forward discards the decoder's second output).
    w1_p, key = init_mlp(key, weight1_dims)
    w3_p, key = init_mlp(key, weight3_dims)

    return {
        "mlp": mlp_p, "fc": fc_p,
        "grid": build_grid(grid_dims),
        "fold1": fold1_p, "fold2": fold2_p,
        "weight1": w1_p, "weight3": w3_p,
    }


# ----------------------------------------------------------------------------
# Pure-JAX f32 reference (same semantics) for a numerical sanity check
# ----------------------------------------------------------------------------

def reference_forward(pc_b3n, params):
    h = jnp.transpose(pc_b3n, (0, 2, 1))                   # (B, N, 3)
    for W, b in params["mlp"]:
        h = jax.nn.relu(h @ W + b)
    glob = jnp.max(h, axis=1)                              # (B, C_enc)
    f = glob
    fc_p = params["fc"]
    for i, (W, b) in enumerate(fc_p):
        f = f @ W + b
        if i < len(fc_p) - 1:
            f = jax.nn.relu(f)
    cw = f                                                 # (B, F)
    B = cw.shape[0]
    g = jnp.transpose(params["grid"])                      # (M, 2)
    M = g.shape[0]
    cw_t = jnp.broadcast_to(cw[:, None, :], (B, M, cw.shape[1]))
    h = jnp.concatenate([cw_t, jnp.broadcast_to(g[None], (B, M, 2))], axis=-1)
    f1 = params["fold1"]
    for i, (W, b) in enumerate(f1):
        h = h @ W + b
        if i < len(f1) - 1:
            h = jax.nn.relu(h)
    fold1 = h
    h = jnp.concatenate([cw_t, fold1], axis=-1)
    f2 = params["fold2"]
    for i, (W, b) in enumerate(f2):
        h = h @ W + b
        if i < len(f2) - 1:
            h = jax.nn.relu(h)
    return jnp.transpose(h, (0, 2, 1))                     # (B, 3, M)


# ----------------------------------------------------------------------------
# Main
# ----------------------------------------------------------------------------

if __name__ == "__main__":
    # Small synthetic configuration consistent with the module's constructor.
    B, N = 2, 1024                               # 2 clouds of 1024 points
    mlp_dims = (3, 16, 32, 64)
    fc_dims = (64, 64, 32)
    grid_dims = (16, 16)                         # M = 256 folded points
    Folding1_dims = (fc_dims[-1] + 2, 32, 3)     # codeword ++ 2D grid -> 3D
    Folding2_dims = (fc_dims[-1] + 3, 32, 3)     # codeword ++ fold1    -> 3D
    Weight1_dims = (fc_dims[-1] + 2, 32, 16)
    Weight3_dims = (fc_dims[-1] + 3, 32, 16)

    key = jax.random.PRNGKey(0)
    key_params, key_data = jax.random.split(key)

    params = build_pcn_foldingnet_params(
        key_params, mlp_dims, fc_dims, grid_dims,
        Folding1_dims, Folding2_dims, Weight1_dims, Weight3_dims)

    # One-time weight packing (steady-state forward is a single pallas_call).
    prepared, layout = prepare_params(params)

    pc = jax.random.normal(key_data, (B, 3, N), jnp.float32)  # PyTorch layout

    out = jax.block_until_ready(
        pcn_foldingnet_forward(pc, prepared, layout=layout))

    expected_shape = (B, 3, grid_dims[0] * grid_dims[1])
    assert out.shape == expected_shape, (out.shape, expected_shape)
    assert bool(jnp.all(jnp.isfinite(out)))

    # Numerical sanity check against a pure-JAX f32 reference (encoder uses
    # bf16 matmul operands, hence the loose tolerance; decoder is f32).
    ref = reference_forward(pc, params)
    max_err = float(jnp.max(jnp.abs(out - ref)))
    assert max_err < 2e-1, f"kernel/reference mismatch: max |diff| = {max_err}"

    print("KERNEL_OK")
</pallas_src>

<mosaic_0001>
module attributes {stable_mosaic.version = 11 : i64} {
  func.func @fused_pcn_kernel(%arg0: i32, %arg1: memref<1x3x1024xbf16, #tpu.memory_space<vmem>>, %arg2: memref<2x256xf32, #tpu.memory_space<vmem>>, %arg3: memref<352x128xf32, #tpu.memory_space<vmem>>, %arg4: memref<352x1xf32, #tpu.memory_space<vmem>>, %arg5: memref<1x3x256xf32, #tpu.memory_space<vmem>>) attributes {dimension_semantics = [#tpu.dimension_semantics<parallel>], iteration_bounds = array<i64: 2>, scalar_prefetch = 0 : i64, scratch_operands = 0 : i64, tpu.core_type = #tpu.core_type<tc>, window_params = [{transform_indices = @transform_0, window_bounds = array<i64: 1, 3, 1024>}, {pipeline_mode = #tpu.pipeline_mode<synchronous>, transform_indices = @transform_1, window_bounds = array<i64: 2, 256>}, {pipeline_mode = #tpu.pipeline_mode<synchronous>, transform_indices = @transform_2, window_bounds = array<i64: 352, 128>}, {pipeline_mode = #tpu.pipeline_mode<synchronous>, transform_indices = @transform_3, window_bounds = array<i64: 352, 1>}, {transform_indices = @transform_4, window_bounds = array<i64: 1, 3, 256>}]} {
    %c0 = arith.constant 0 : index
    %c0_0 = arith.constant 0 : index
    %c0_1 = arith.constant 0 : index
    %0 = vector.load %arg1[%c0, %c0_0, %c0_1] : memref<1x3x1024xbf16, #tpu.memory_space<vmem>>, vector<1x3x1024xbf16>
    %1 = vector.shape_cast %0 : vector<1x3x1024xbf16> to vector<3x1024xbf16>
    %c0_2 = arith.constant 0 : index
    %c0_3 = arith.constant 0 : index
    %2 = vector.load %arg3[%c0_2, %c0_3] : memref<352x128xf32, #tpu.memory_space<vmem>>, vector<16x3xf32>
    %3 = arith.truncf %2 : vector<16x3xf32> to vector<16x3xbf16>
    %cst = arith.constant dense<0.000000e+00> : vector<16x1024xf32>
    %4 = tpu.matmul %3, %1, %cst {dimension_numbers = #tpu.dot_dimension_numbers<[1], [0], [0], [1], [0, 0, 1, 1], [], []>} : vector<16x3xbf16>, vector<3x1024xbf16>, vector<16x1024xf32> -> vector<16x1024xf32>
    %c0_4 = arith.constant 0 : index
    %c0_5 = arith.constant 0 : index
    %5 = vector.load %arg4[%c0_4, %c0_5] : memref<352x1xf32, #tpu.memory_space<vmem>>, vector<16x1xf32>
    %6 = vector.broadcast %5 : vector<16x1xf32> to vector<16x1024xf32>
    %7 = arith.addf %4, %6 : vector<16x1024xf32>
    %cst_6 = arith.constant 0.000000e+00 : f32
    %8 = vector.broadcast %cst_6 : f32 to vector<16x1024xf32>
    %9 = arith.maximumf %7, %8 : vector<16x1024xf32>
    %c16 = arith.constant 16 : index
    %c0_7 = arith.constant 0 : index
    %10 = vector.load %arg3[%c16, %c0_7] : memref<352x128xf32, #tpu.memory_space<vmem>>, vector<32x16xf32>
    %11 = arith.truncf %10 : vector<32x16xf32> to vector<32x16xbf16>
    %12 = arith.truncf %9 : vector<16x1024xf32> to vector<16x1024xbf16>
    %cst_8 = arith.constant dense<0.000000e+00> : vector<32x1024xf32>
    %13 = tpu.matmul %11, %12, %cst_8 {dimension_numbers = #tpu.dot_dimension_numbers<[1], [0], [0], [1], [0, 0, 1, 1], [], []>} : vector<32x16xbf16>, vector<16x1024xbf16>, vector<32x1024xf32> -> vector<32x1024xf32>
    %c16_9 = arith.constant 16 : index
    %c0_10 = arith.constant 0 : index
    %14 = vector.load %arg4[%c16_9, %c0_10] : memref<352x1xf32, #tpu.memory_space<vmem>>, vector<32x1xf32>
    %15 = vector.broadcast %14 : vector<32x1xf32> to vector<32x1024xf32>
    %16 = arith.addf %13, %15 : vector<32x1024xf32>
    %cst_11 = arith.constant 0.000000e+00 : f32
    %17 = vector.broadcast %cst_11 : f32 to vector<32x1024xf32>
    %18 = arith.maximumf %16, %17 : vector<32x1024xf32>
    %c48 = arith.constant 48 : index
    %c0_12 = arith.constant 0 : index
    %19 = vector.load %arg3[%c48, %c0_12] : memref<352x128xf32, #tpu.memory_space<vmem>>, vector<64x32xf32>
    %20 = arith.truncf %19 : vector<64x32xf32> to vector<64x32xbf16>
    %21 = arith.truncf %18 : vector<32x1024xf32> to vector<32x1024xbf16>
    %cst_13 = arith.constant dense<0.000000e+00> : vector<64x1024xf32>
    %22 = tpu.matmul %20, %21, %cst_13 {dimension_numbers = #tpu.dot_dimension_numbers<[1], [0], [0], [1], [0, 0, 1, 1], [], []>} : vector<64x32xbf16>, vector<32x1024xbf16>, vector<64x1024xf32> -> vector<64x1024xf32>
    %c48_14 = arith.constant 48 : index
    %c0_15 = arith.constant 0 : index
    %23 = vector.load %arg4[%c48_14, %c0_15] : memref<352x1xf32, #tpu.memory_space<vmem>>, vector<64x1xf32>
    %24 = vector.broadcast %23 : vector<64x1xf32> to vector<64x1024xf32>
    %25 = arith.addf %22, %24 : vector<64x1024xf32>
    %cst_16 = arith.constant 0.000000e+00 : f32
    %26 = vector.broadcast %cst_16 : f32 to vector<64x1024xf32>
    %27 = arith.maximumf %25, %26 : vector<64x1024xf32>
    %cst_17 = arith.constant dense<0xFF800000> : vector<64xf32>
    %28 = vector.multi_reduction <maximumf>, %27, %cst_17 [1] : vector<64x1024xf32> to vector<64xf32>
    %29 = vector.shape_cast %28 : vector<64xf32> to vector<64x1xf32>
    %c112 = arith.constant 112 : index
    %c0_18 = arith.constant 0 : index
    %30 = vector.load %arg3[%c112, %c0_18] : memref<352x128xf32, #tpu.memory_space<vmem>>, vector<64x64xf32>
    %cst_19 = arith.constant dense<0.000000e+00> : vector<64x1xf32>
    %31 = tpu.matmul %30, %29, %cst_19 {dimension_numbers = #tpu.dot_dimension_numbers<[1], [0], [0], [1], [0, 0, 1, 1], [], []>} : vector<64x64xf32>, vector<64x1xf32>, vector<64x1xf32> -> vector<64x1xf32>
    %c112_20 = arith.constant 112 : index
    %c0_21 = arith.constant 0 : index
    %32 = vector.load %arg4[%c112_20, %c0_21] : memref<352x1xf32, #tpu.memory_space<vmem>>, vector<64x1xf32>
    %33 = arith.addf %31, %32 : vector<64x1xf32>
    %cst_22 = arith.constant 0.000000e+00 : f32
    %34 = vector.broadcast %cst_22 : f32 to vector<64x1xf32>
    %35 = arith.maximumf %33, %34 : vector<64x1xf32>
    %c176 = arith.constant 176 : index
    %c0_23 = arith.constant 0 : index
    %36 = vector.load %arg3[%c176, %c0_23] : memref<352x128xf32, #tpu.memory_space<vmem>>, vector<32x64xf32>
    %cst_24 = arith.constant dense<0.000000e+00> : vector<32x1xf32>
    %37 = tpu.matmul %36, %35, %cst_24 {dimension_numbers = #tpu.dot_dimension_numbers<[1], [0], [0], [1], [0, 0, 1, 1], [], []>} : vector<32x64xf32>, vector<64x1xf32>, vector<32x1xf32> -> vector<32x1xf32>
    %c176_25 = arith.constant 176 : index
    %c0_26 = arith.constant 0 : index
    %38 = vector.load %arg4[%c176_25, %c0_26] : memref<352x1xf32, #tpu.memory_space<vmem>>, vector<32x1xf32>
    %39 = arith.addf %37, %38 : vector<32x1xf32>
    %c0_27 = arith.constant 0 : index
    %c0_28 = arith.constant 0 : index
    %40 = vector.load %arg2[%c0_27, %c0_28] : memref<2x256xf32, #tpu.memory_space<vmem>>, vector<2x256xf32>
    %c208 = arith.constant 208 : index
    %c0_29 = arith.constant 0 : index
    %41 = vector.load %arg3[%c208, %c0_29] : memref<352x128xf32, #tpu.memory_space<vmem>>, vector<32x32xf32>
    %cst_30 = arith.constant dense<0.000000e+00> : vector<32x1xf32>
    %42 = tpu.matmul %41, %39, %cst_30 {dimension_numbers = #tpu.dot_dimension_numbers<[1], [0], [0], [1], [0, 0, 1, 1], [], []>} : vector<32x32xf32>, vector<32x1xf32>, vector<32x1xf32> -> vector<32x1xf32>
    %c208_31 = arith.constant 208 : index
    %c0_32 = arith.constant 0 : index
    %43 = vector.load %arg4[%c208_31, %c0_32] : memref<352x1xf32, #tpu.memory_space<vmem>>, vector<32x1xf32>
    %44 = arith.addf %42, %43 : vector<32x1xf32>
    %c240 = arith.constant 240 : index
    %c0_33 = arith.constant 0 : index
    %45 = vector.load %arg3[%c240, %c0_33] : memref<352x128xf32, #tpu.memory_space<vmem>>, vector<32x2xf32>
    %cst_34 = arith.constant dense<0.000000e+00> : vector<32x256xf32>
    %46 = tpu.matmul %45, %40, %cst_34 {dimension_numbers = #tpu.dot_dimension_numbers<[1], [0], [0], [1], [0, 0, 1, 1], [], []>} : vector<32x2xf32>, vector<2x256xf32>, vector<32x256xf32> -> vector<32x256xf32>
    %47 = vector.broadcast %44 : vector<32x1xf32> to vector<32x256xf32>
    %48 = arith.addf %46, %47 : vector<32x256xf32>
    %cst_35 = arith.constant 0.000000e+00 : f32
    %49 = vector.broadcast %cst_35 : f32 to vector<32x256xf32>
    %50 = arith.maximumf %48, %49 : vector<32x256xf32>
    %c272 = arith.constant 272 : index
    %c0_36 = arith.constant 0 : index
    %51 = vector.load %arg3[%c272, %c0_36] : memref<352x128xf32, #tpu.memory_space<vmem>>, vector<3x32xf32>
    %cst_37 = arith.constant dense<0.000000e+00> : vector<3x256xf32>
    %52 = tpu.matmul %51, %50, %cst_37 {dimension_numbers = #tpu.dot_dimension_numbers<[1], [0], [0], [1], [0, 0, 1, 1], [], []>} : vector<3x32xf32>, vector<32x256xf32>, vector<3x256xf32> -> vector<3x256xf32>
    %c272_38 = arith.constant 272 : index
    %c0_39 = arith.constant 0 : index
    %53 = vector.load %arg4[%c272_38, %c0_39] : memref<352x1xf32, #tpu.memory_space<vmem>>, vector<3x1xf32>
    %54 = vector.broadcast %53 : vector<3x1xf32> to vector<3x256xf32>
    %55 = arith.addf %52, %54 : vector<3x256xf32>
    %c280 = arith.constant 280 : index
    %c0_40 = arith.constant 0 : index
    %56 = vector.load %arg3[%c280, %c0_40] : memref<352x128xf32, #tpu.memory_space<vmem>>, vector<32x32xf32>
    %cst_41 = arith.constant dense<0.000000e+00> : vector<32x1xf32>
    %57 = tpu.matmul %56, %39, %cst_41 {dimension_numbers = #tpu.dot_dimension_numbers<[1], [0], [0], [1], [0, 0, 1, 1], [], []>} : vector<32x32xf32>, vector<32x1xf32>, vector<32x1xf32> -> vector<32x1xf32>
    %c280_42 = arith.constant 280 : index
    %c0_43 = arith.constant 0 : index
    %58 = vector.load %arg4[%c280_42, %c0_43] : memref<352x1xf32, #tpu.memory_space<vmem>>, vector<32x1xf32>
    %59 = arith.addf %57, %58 : vector<32x1xf32>
    %c312 = arith.constant 312 : index
    %c0_44 = arith.constant 0 : index
    %60 = vector.load %arg3[%c312, %c0_44] : memref<352x128xf32, #tpu.memory_space<vmem>>, vector<32x3xf32>
    %cst_45 = arith.constant dense<0.000000e+00> : vector<32x256xf32>
    %61 = tpu.matmul %60, %55, %cst_45 {dimension_numbers = #tpu.dot_dimension_numbers<[1], [0], [0], [1], [0, 0, 1, 1], [], []>} : vector<32x3xf32>, vector<3x256xf32>, vector<32x256xf32> -> vector<32x256xf32>
    %62 = vector.broadcast %59 : vector<32x1xf32> to vector<32x256xf32>
    %63 = arith.addf %61, %62 : vector<32x256xf32>
    %cst_46 = arith.constant 0.000000e+00 : f32
    %64 = vector.broadcast %cst_46 : f32 to vector<32x256xf32>
    %65 = arith.maximumf %63, %64 : vector<32x256xf32>
    %c344 = arith.constant 344 : index
    %c0_47 = arith.constant 0 : index
    %66 = vector.load %arg3[%c344, %c0_47] : memref<352x128xf32, #tpu.memory_space<vmem>>, vector<3x32xf32>
    %cst_48 = arith.constant dense<0.000000e+00> : vector<3x256xf32>
    %67 = tpu.matmul %66, %65, %cst_48 {dimension_numbers = #tpu.dot_dimension_numbers<[1], [0], [0], [1], [0, 0, 1, 1], [], []>} : vector<3x32xf32>, vector<32x256xf32>, vector<3x256xf32> -> vector<3x256xf32>
    %c344_49 = arith.constant 344 : index
    %c0_50 = arith.constant 0 : index
    %68 = vector.load %arg4[%c344_49, %c0_50] : memref<352x1xf32, #tpu.memory_space<vmem>>, vector<3x1xf32>
    %69 = vector.broadcast %68 : vector<3x1xf32> to vector<3x256xf32>
    %70 = arith.addf %67, %69 : vector<3x256xf32>
    %c0_51 = arith.constant 0 : index
    %c0_52 = arith.constant 0 : index
    %c0_53 = arith.constant 0 : index
    %71 = vector.load %arg5[%c0_51, %c0_52, %c0_53] : memref<1x3x256xf32, #tpu.memory_space<vmem>>, vector<1x3x256xf32>
    %72 = vector.shape_cast %71 : vector<1x3x256xf32> to vector<3x256xf32>
    %73 = vector.shape_cast %70 : vector<3x256xf32> to vector<1x3x256xf32>
    tpu.vector_store %arg5[%c0_51, %c0_52, %c0_53], %73 {strides = array<i32>} : memref<1x3x256xf32, #tpu.memory_space<vmem>>, vector<1x3x256xf32>,
    return
  }
  func.func @transform_0(%arg0: i32) -> (i32, i32, i32) {
    %c0_i32 = arith.constant 0 : i32
    %c0_i32_0 = arith.constant 0 : i32
    %c0_i32_1 = arith.constant 0 : i32
    return %arg0, %c0_i32, %c0_i32_0 : i32, i32, i32
  }
  func.func @transform_1(%arg0: i32) -> (i32, i32) {
    %c0_i32 = arith.constant 0 : i32
    %c0_i32_0 = arith.constant 0 : i32
    %c0_i32_1 = arith.constant 0 : i32
    return %c0_i32, %c0_i32_0 : i32, i32
  }
  func.func @transform_2(%arg0: i32) -> (i32, i32) {
    %c0_i32 = arith.constant 0 : i32
    %c0_i32_0 = arith.constant 0 : i32
    %c0_i32_1 = arith.constant 0 : i32
    return %c0_i32, %c0_i32_0 : i32, i32
  }
  func.func @transform_3(%arg0: i32) -> (i32, i32) {
    %c0_i32 = arith.constant 0 : i32
    %c0_i32_0 = arith.constant 0 : i32
    %c0_i32_1 = arith.constant 0 : i32
    return %c0_i32, %c0_i32_0 : i32, i32
  }
  func.func @transform_4(%arg0: i32) -> (i32, i32, i32) {
    %c0_i32 = arith.constant 0 : i32
    %c0_i32_0 = arith.constant 0 : i32
    %c0_i32_1 = arith.constant 0 : i32
    return %arg0, %c0_i32, %c0_i32_0 : i32, i32, i32
  }
}

</mosaic_0001>

<bundles_post_ra>
// kernel: pcn_foldingnet_forward.1
= control target key start
LH: loop header
LB: loop body
LE: loop exit
PB: predicated region body
PF: predicated region fallthrough
CT: control target
= control target key end

     0   :  { %s2572_s15 = smov 0   ;;  %s3111_s0 = inlined_call_operand.vmem [shape: bf16[2,3,1024], index: 0, kind: input, shape index: {}]   ;;  %s3112_s1 = inlined_call_operand.vmem [shape: f32[2,256], index: 1, kind: input, shape index: {}]   ;;  %s3113_s2 = inlined_call_operand.vmem [shape: f32[352,128], index: 2, kind: input, shape index: {}]   ;;  %s3114_s3 = inlined_call_operand.vmem [shape: f32[352,1], index: 3, kind: input, shape index: {}]   ;;  %s3115_s4 = inlined_call_operand.vmem [shape: f32[2,3,256], index: 4, kind: output, shape index: {}]  }
   0x1 LB: > { %s2257_s16 = sadd.s32 4294967295, %s2541_s15   ;;  %p2261_p0 = scmp.ge.s32.totalorder %s2541_s15, 1  ;;  %s2541_s15 = sphi %s2572_s15, %s14_s15  }
   0x2   : > { %p162_p1 = scmp.lt.s32.totalorder %s2541_s15, 3 }
   0x4   : > { %p163_p2 = pnand %p2261_p0, %p162_p1 }
   0x5   : > { %p188_p3 = scmp.lt.s32.totalorder (!%p163_p2), %s2257_s16, 1  ;;  %v222_v0 = vlaneseq (!%p163_p2)  ;;  %vm256_vm0 = vcmask (!%p163_p2), 1040384   ;;  %v2543_v1 = vmov (!%p163_p2), 1983009808   ;;  %v204_v3 = vld [vmem:[%s3114_s3] sm:$0xff] (!%p163_p2)  ;;  %v2544_v5 = vmov (!%p163_p2), 0  }
   0x6   : > { %166 = sbr.rel (%p163_p2) target bundleno = 2410 (0x96a), region = 36  ;;  %v220_v2 = vunpack.c.l.s4 (!%p163_p2), %v2543_v1  ;;  %316 = vmatprep.mubr.bf16.mxu1 (!%p163_p2), %v2544_v5  ;;  %402 = vmatprep.mubr.bf16.mxu0 (!%p163_p2), %v2544_v5  ;;  %vm257_vm1 = vcmask (!%p163_p2), 1041408   ;;  %v2545_v7 = vmov (!%p163_p2), 65535   ;;  %v205_v10 = vld [vmem:[%s3114_s3 + $0x8] sm:$0xff] (!%p163_p2)  ;;  %v488_v20 = vld [vmem:[%s3114_s3 + $0x20] sm:$0xff] (!%p163_p2)  ;;  %v789_v32 = vld [vmem:[%s3114_s3 + $0x30] sm:$0xff] (!%p163_p2) }
   0x7   : > { %v223_v4 = vshrl.u32 (!%p163_p2), %v222_v0, 7  ;;  %v258_v8 = vsel (!%p163_p2), %vm256_vm0, 4294967295, %v2545_v7  ;;  %2531 = vset.pattern.permute.xlu0 (!%p163_p2), %v2544_v5  ;;  %2532 = vset.pattern.permute.xlu1 (!%p163_p2), %v2544_v5  ;;  %v201_v23 = vld [vmem:[%s3113_s2] sm:$0xff] (!%p163_p2)  ;;  %v202_v24 = vld [vmem:[%s3113_s2 + $0x8] sm:$0xff] (!%p163_p2)  ;;  %vm252_vm2 = vcmask (!%p163_p2), 23552   ;;  %v793_v37 = vld [vmem:[%s3114_s3 + $0x50] sm:$0xff] (!%p163_p2) }
   0x8   : > { %v221_v6 = vunpack.c.0.s8 (!%p163_p2), %v220_v2  ;;  %208 = vperm.xlu0 (!%p163_p2), %2531, %v204_v3   ;;  %v259_v12 = vsel (!%p163_p2), %vm257_vm1, %v258_v8, 0  ;;  %v203_v31 = vpack.c.bf16 (!%p163_p2), %v202_v24, %v201_v23  ;;  %v791_v36 = vld [vmem:[%s3114_s3 + $0x40] sm:$0xff] (!%p163_p2)  ;;  %v486_v40 = vld [vmem:[%s3114_s3 + $0x10] sm:$0xff] (!%p163_p2)  ;;  %v487_v41 = vld [vmem:[%s3114_s3 + $0x18] sm:$0xff] (!%p163_p2)  ;;  %vm510_vm3 = vcmask (!%p163_p2), 130048  }
   0x9   : > { %v795_v39 = vld [vmem:[%s3114_s3 + $0x60] sm:$0xff] (!%p163_p2)  ;;  %492 = vperm.xlu1 (!%p163_p2), %2532, %v486_v40   ;;  %v489_v42 = vld [vmem:[%s3114_s3 + $0x28] sm:$0xff] (!%p163_p2)  ;;  %v790_v43 = vld [vmem:[%s3114_s3 + $0x38] sm:$0xff] (!%p163_p2)  ;;  %vm837_vm4 = vcmask (!%p163_p2), 261120   ;;  %vm1294_vm5 = vcmask (!%p163_p2), 523264   ;;  %vm1676_vm6 = vcmask (!%p163_p2), 15360  }
   0xa   : > { %v224_v9 = vsub.s32 (!%p163_p2), %v221_v6, %v223_v4  ;;  %v792_v44 = vld [vmem:[%s3114_s3 + $0x48] sm:$0xff] (!%p163_p2)  ;;  %v794_v45 = vld [vmem:[%s3114_s3 + $0x58] sm:$0xff] (!%p163_p2)  ;;  %vm2012_vm7 = vcmask (!%p163_p2), 1042432  }
   0xb   : > { %v796_v46 = vld [vmem:[%s3114_s3 + $0x68] sm:$0xff] (!%p163_p2) }
   0xc   : > { %213 = vperm.xlu0 (!%p163_p2), %2531, %v205_v10  }
   0xd   : > { %s3117_s16 = smov (!%p188_p3, %s2257_s16), 1  ;;  %497 = vperm.xlu1 %2532, %v487_v41  }
   0xe   : > { %s2331_s19 = sshll.u32 %s3117_s16, 4  ;;  %s2332_s13 = sshll.u32 %s3117_s16, 3 }
   0xf   : > { %s192_s22 = scalar_lea.vmem %s3111_s0, %s2331_s19  ;;  %s197_s18 = scalar_lea.vmem %s3115_s4, %s2332_s13 }
  0x10   : > { %v199_v11 = vld [vmem:[%s192_s22] sm:$0xff]  ;;  %v200_v13 = vld [vmem:[%s192_s22 + $0x8] sm:$0xff]  ;;  %502 = vperm.xlu0 %2531, %v488_v20  }
  0x11   : > { %v218_v14 = vcombine.high %v199_v11, %v199_v11  ;;  %v225_v15 = vrot.slane %v199_v11, %v224_v9  ;;  %v235_v16 = vcombine.high %v200_v13, %v200_v13  ;;  %v242_v17 = vrot.slane %v200_v13, %v224_v9  ;;  %507 = vperm.xlu1 %2532, %v489_v42   ;;  %v473_v13 = vld [vmem:[%s3113_s2 + $0x18] sm:$0xff] }
  0x13   : > { %v233_v18 = vcombine.high %v225_v15, %v225_v15  ;;  %v250_v19 = vcombine.high %v242_v17, %v242_v17  ;;  %v261_v21 = vand.u32 %v259_v12, %v225_v15  ;;  %v273_v22 = vand.u32 %v259_v12, %v242_v17 }
  0x14   : > { %v232_v25 = vrot.slane %v218_v14, %v224_v9  ;;  %v249_v26 = vrot.slane %v235_v16, %v224_v9  ;;  %799 = vperm.xlu0 %2531, %v789_v32  }
  0x15   : > { %v264_v27 = vand.u32 %v259_v12, %v233_v18  ;;  %v276_v28 = vand.u32 %v259_v12, %v250_v19  ;;  %804 = vperm.xlu1 %2532, %v790_v43  }
  0x16   : > { %v234_v29 = vcombine.high %v232_v25, %v232_v25  ;;  %v251_v30 = vcombine.high %v249_v26, %v249_v26  ;;  %v267_v34 = vand.u32 %v259_v12, %v232_v25  ;;  %v279_v38 = vand.u32 %v259_v12, %v249_v26 }
  0x17   : > { %284 = vmatprep.subr.bf16.mxu1 %v264_v27  ;;  %370 = vmatprep.subr.bf16.mxu0 %v276_v28 }
  0x18   : > { %285 = vmatpush1.bf16.msra.mxu1 %v261_v21  ;;  %371 = vmatpush1.bf16.msra.mxu0 %v273_v22  ;;  %v270_v33 = vand.u32 %v259_v12, %v234_v29  ;;  %v282_v35 = vand.u32 %v259_v12, %v251_v30  ;;  %v472_v12 = vld [vmem:[%s3113_s2 + $0x10] sm:$0xff]  ;;  %v474_v30 = vld [vmem:[%s3113_s2 + $0x20] sm:$0xff] }
  0x19   : > { %809 = vperm.xlu0 %2531, %v791_v36   ;;  %814 = vperm.xlu1 %2532, %v792_v44   ;;  %v476_v21 = vpack.c.bf16 %v473_v13, %v472_v12 }
  0x1a   : > { %327 = vmatprep.subr.bf16.mxu1 %v270_v33 }
  0x1b   : > { %2266 = vmatmul.mubr.msk.bf16.vlgmr.msra.gmra.mrb[0].mxu1 %vm252_vm2, %v203_v31  ;;  %2268 = vmatmul.mubr.msk.bf16.vlgmr.msra.gmra.mrb[0].mxu0 %vm252_vm2, %v203_v31 }
  0x1c   : > { %328 = vmatpush1.bf16.msra.mxu1 %v267_v34  ;;  %359 = vmatprep.mubr.bf16.mxu1 %v2544_v5 }
  0x1d   : > { %413 = vmatprep.subr.bf16.mxu1 %v282_v35  ;;  %549 = vmatprep.mubr.bf16.mxu0 %v2544_v5 }
  0x1e   : > { %819 = vperm.xlu0 %2531, %v793_v37   ;;  %824 = vperm.xlu1 %2532, %v794_v45  }
  0x22   : > { %829 = vperm.xlu0 %2531, %v795_v39   ;;  %834 = vperm.xlu1 %2532, %v796_v46  }
  0x23   : > { %2267 = vmatmul.mubr.msk.bf16.vlgmr.msra.gmra.mrb[4].mxu1 %vm252_vm2, %v203_v31 }
  0x24   : > { %414 = vmatpush1.bf16.msra.mxu1 %v279_v38  ;;  %445 = vmatprep.mubr.bf16.mxu1 %v2544_v5 }
  0x2b   : > { %2269 = vmatmul.mubr.msk.bf16.vlgmr.msra.gmra.mrb[8].mxu1 %vm252_vm2, %v203_v31  ;;  %v475_v31 = vld [vmem:[%s3113_s2 + $0x28] sm:$0xff] }
  0x2c   : > { %602 = vmatprep.mubr.bf16.mxu1 %v2544_v5  ;;  %v477_v38 = vpack.c.bf16 %v475_v31, %v474_v30  ;;  %v762_v30 = vld [vmem:[%s3113_s2 + $0x38] sm:$0xff] }
  0x87   : > { %v209_v47 = vpop.permute.xlu0 %208 }
  0x8b   : > { %v2647_v48 = vpop.permute.xlu0 %213 }
  0xee   : > { %v318_v49 = vpop.f32.mrb[0].mxu1  ;;  %v404_v50 = vpop.f32.mrb[0].mxu0 }
  0xef   : > { %v319_v51 = vadd.f32 %v318_v49, %v209_v47  ;;  %v405_v52 = vadd.f32 %v404_v50, %v209_v47  ;;  %v320_v53 = vpop.f32.mrb[1].mxu1  ;;  %v406_v54 = vpop.f32.mrb[1].mxu0 }
  0xf0   : > { %v321_v55 = vadd.f32 %v320_v53, %v209_v47  ;;  %v407_v56 = vadd.f32 %v406_v54, %v209_v47  ;;  %v322_v57 = vpop.f32.mrb[2].mxu1  ;;  %v408_v58 = vpop.f32.mrb[2].mxu0 }
  0xf1   : > { %v460_v59 = vmax.f32 %v405_v52, 0.0  ;;  %v323_v60 = vadd.f32 %v322_v57, %v2647_v48  ;;  %v409_v61 = vadd.f32 %v408_v58, %v2647_v48  ;;  %v324_v62 = vpop.f32.mrb[3].mxu1  ;;  %v410_v63 = vpop.f32.mrb[3].mxu0  ;;  %v456_v3 = vmax.f32 %v319_v51, 0.0 }
  0xf2   : > { %v461_v0 = vmax.f32 %v407_v56, 0.0  ;;  %v325_v1 = vadd.f32 %v324_v62, %v2647_v48  ;;  %v411_v2 = vadd.f32 %v410_v63, %v2647_v48  ;;  %v457_v7 = vmax.f32 %v321_v55, 0.0  ;;  %v2693_v62 = vpop.permute.xlu0 %502 }
  0xf3   : > { %v464_v4 = vmax.f32 %v323_v60, 0.0  ;;  %v468_v6 = vmax.f32 %v409_v61, 0.0 }
  0xf4   : > { %v465_v8 = vmax.f32 %v325_v1, 0.0  ;;  %v469_v9 = vmax.f32 %v411_v2, 0.0 }
  0xf5   : > { %v478_v10 = vpack.c.bf16 %v464_v4, %v456_v3  ;;  %v482_v11 = vpack.c.bf16 %v468_v6, %v460_v59 }
  0xf6   : > { %v479_v14 = vpack.c.bf16 %v465_v8, %v457_v7  ;;  %v483_v15 = vpack.c.bf16 %v469_v9, %v461_v0  ;;  %v361_v16 = vpop.f32.mrb[4].mxu1 }
  0xf7   : > { %v362_v17 = vadd.f32 %v361_v16, %v209_v47  ;;  %v363_v18 = vpop.f32.mrb[5].mxu1 }
  0xf8   : > { %v364_v19 = vadd.f32 %v363_v18, %v209_v47  ;;  %v365_v20 = vpop.f32.mrb[6].mxu1  ;;  %517 = vmatprep.subr.bf16.mxu0 %v479_v14 }
  0xf9   : > { %v366_v22 = vadd.f32 %v365_v20, %v2647_v48  ;;  %v367_v23 = vpop.f32.mrb[7].mxu1  ;;  %518 = vmatpush1.bf16.msra.mxu0 %v478_v10  ;;  %v458_v25 = vmax.f32 %v362_v17, 0.0 }
  0xfa   : > { %v368_v24 = vadd.f32 %v367_v23, %v2647_v48  ;;  %623 = vmatprep.subr.bf16.mxu0 %v483_v15  ;;  %v459_v27 = vmax.f32 %v364_v19, 0.0 }
  0xfb   : > { %v466_v26 = vmax.f32 %v366_v22, 0.0 }
  0xfc   : > { %v467_v28 = vmax.f32 %v368_v24, 0.0  ;;  %2270 = vmatmul.mubr.msk.bf16.vlgmr.msra.gmra.mrb[4].mxu0 %vm510_vm3, %v476_v21 }
  0xfd   : > { %v480_v29 = vpack.c.bf16 %v466_v26, %v458_v25  ;;  %624 = vmatpush1.bf16.msra.mxu0 %v482_v11  ;;  %559 = vmatprep.mubr.bf16.mxu0 %v2544_v5 }
  0xfe   : > { %v481_v32 = vpack.c.bf16 %v467_v28, %v459_v27  ;;  %v447_v33 = vpop.f32.mrb[8].mxu1 }
  0xff   : > { %v448_v34 = vadd.f32 %v447_v33, %v209_v47  ;;  %v449_v35 = vpop.f32.mrb[9].mxu1 }
 0x100   : > { %v450_v36 = vadd.f32 %v449_v35, %v209_v47  ;;  %v451_v37 = vpop.f32.mrb[10].mxu1  ;;  %570 = vmatprep.subr.bf16.mxu1 %v481_v32 }
 0x101   : > { %v452_v39 = vadd.f32 %v451_v37, %v2647_v48  ;;  %v453_v40 = vpop.f32.mrb[11].mxu1  ;;  %571 = vmatpush1.bf16.msra.mxu1 %v480_v29  ;;  %v462_v42 = vmax.f32 %v448_v34, 0.0  ;;  %v761_v29 = vld [vmem:[%s3113_s2 + $0x30] sm:$0xff] }
 0x102   : > { %v454_v41 = vadd.f32 %v453_v40, %v2647_v48  ;;  %v463_v44 = vmax.f32 %v450_v36, 0.0  ;;  %v2685_v48 = vpop.permute.xlu1 %492 }
 0x103   : > { %v470_v43 = vmax.f32 %v452_v39, 0.0 }
 0x104   : > { %v471_v45 = vmax.f32 %v454_v41, 0.0  ;;  %2271 = vmatmul.mubr.msk.bf16.gmra.mrb[8].mxu0 %vm510_vm3, %v477_v38  ;;  %2272 = vmatmul.mubr.msk.bf16.vlgmr.msra.gmra.mrb[12].mxu1 %vm510_vm3, %v476_v21 }
 0x105   : > { %v484_v46 = vpack.c.bf16 %v470_v43, %v462_v42  ;;  %612 = vmatprep.mubr.bf16.mxu1 %v2544_v5  ;;  %655 = vmatprep.mubr.bf16.mxu0 %v2544_v5  ;;  %v2715_v43 = vpack.c.bf16 %v762_v30, %v761_v29 }
 0x106   : > { %v485_v47 = vpack.c.bf16 %v471_v45, %v463_v44  ;;  %v2687_v50 = vpop.permute.xlu1 %497 }
 0x108   : > { %676 = vmatprep.subr.bf16.mxu1 %v485_v47 }
 0x109   : > { %677 = vmatpush1.bf16.msra.mxu1 %v484_v46 }
 0x10a   : > { %v2695_v63 = vpop.permute.xlu1 %507 }
 0x10c   : > { %2273 = vmatmul.mubr.msk.bf16.gmra.mrb[16].mxu1 %vm510_vm3, %v477_v38  ;;  %2274 = vmatmul.mubr.msk.bf16.vlgmr.msra.gmra.mrb[12].mxu0 %vm510_vm3, %v476_v21 }
 0x10d   : > { %665 = vmatprep.mubr.bf16.mxu0 %v2544_v5  ;;  %708 = vmatprep.mubr.bf16.mxu1 %v2544_v5 }
 0x114   : > { %2275 = vmatmul.mubr.msk.bf16.gmra.mrb[16].mxu0 %vm510_vm3, %v477_v38  ;;  %2276 = vmatmul.mubr.msk.bf16.vlgmr.msra.gmra.mrb[20].mxu1 %vm510_vm3, %v476_v21 }
 0x115   : > { %718 = vmatprep.mubr.bf16.mxu1 %v2544_v5  ;;  %882 = vmatprep.mubr.bf16.mxu0 %v2544_v5 }
 0x11c   : > { %2277 = vmatmul.mubr.msk.bf16.gmra.mrb[24].mxu1 %vm510_vm3, %v477_v38 }
 0x11d   : > { %955 = vmatprep.mubr.bf16.mxu1 %v2544_v5 }
 0x1cf   : > { %v551_v49 = vpop.f32.mrb[4].mxu0 }
 0x1d0   : > { %v552_v51 = vadd.f32 %v551_v49, %v2685_v48  ;;  %v553_v52 = vpop.f32.mrb[5].mxu0 }
 0x1d1   : > { %v554_v53 = vadd.f32 %v553_v52, %v2685_v48  ;;  %v555_v54 = vpop.f32.mrb[6].mxu0 }
 0x1d2   : > { %v729_v55 = vmax.f32 %v552_v51, 0.0  ;;  %v556_v56 = vadd.f32 %v555_v54, %v2687_v50  ;;  %v557_v57 = vpop.f32.mrb[7].mxu0 }
 0x1d3   : > { %v730_v58 = vmax.f32 %v554_v53, 0.0  ;;  %v558_v59 = vadd.f32 %v557_v57, %v2687_v50 }
 0x1d4   : > { %v737_v60 = vmax.f32 %v556_v56, 0.0 }
 0x1d5   : > { %v738_v61 = vmax.f32 %v558_v59, 0.0 }
 0x1d6   : > { %v773_v0 = vpack.c.bf16 %v737_v60, %v729_v55 }
 0x1d7   : > { %v774_v1 = vpack.c.bf16 %v738_v61, %v730_v58  ;;  %v561_v2 = vpop.f32.mrb[8].mxu0  ;;  %v604_v3 = vpop.f32.mrb[12].mxu1 }
 0x1d8   : > { %v562_v4 = vadd.f32 %v561_v2, %v2693_v62  ;;  %v605_v6 = vadd.f32 %v604_v3, %v2685_v48  ;;  %v563_v7 = vpop.f32.mrb[9].mxu0  ;;  %v606_v8 = vpop.f32.mrb[13].mxu1 }
 0x1d9   : > { %v564_v9 = vadd.f32 %v563_v7, %v2693_v62  ;;  %v607_v10 = vadd.f32 %v606_v8, %v2685_v48  ;;  %v565_v11 = vpop.f32.mrb[10].mxu0  ;;  %v608_v12 = vpop.f32.mrb[14].mxu1  ;;  %850 = vmatprep.subr.bf16.mxu0 %v774_v1  ;;  %v764_v1 = vld [vmem:[%s3113_s2 + $0x48] sm:$0xff] }
 0x1da   : > { %v566_v13 = vadd.f32 %v565_v11, %v2695_v63  ;;  %v609_v14 = vadd.f32 %v608_v12, %v2687_v50  ;;  %v567_v15 = vpop.f32.mrb[11].mxu0  ;;  %v610_v16 = vpop.f32.mrb[15].mxu1  ;;  %851 = vmatpush1.bf16.msra.mxu0 %v773_v0  ;;  %v745_v19 = vmax.f32 %v562_v4, 0.0  ;;  %v731_v20 = vmax.f32 %v605_v6, 0.0  ;;  %v763_v0 = vld [vmem:[%s3113_s2 + $0x40] sm:$0xff] }
 0x1db   : > { %v568_v17 = vadd.f32 %v567_v15, %v2695_v63  ;;  %v611_v18 = vadd.f32 %v610_v16, %v2687_v50  ;;  %v746_v23 = vmax.f32 %v564_v9, 0.0  ;;  %v732_v24 = vmax.f32 %v607_v10, 0.0 }
 0x1dc   : > { %v753_v21 = vmax.f32 %v566_v13, 0.0  ;;  %v739_v22 = vmax.f32 %v609_v14, 0.0  ;;  %v2734_v15 = vpack.c.bf16 %v764_v1, %v763_v0 }
 0x1dd   : > { %v754_v25 = vmax.f32 %v568_v17, 0.0  ;;  %v740_v26 = vmax.f32 %v611_v18, 0.0 }
 0x1de   : > { %v781_v27 = vpack.c.bf16 %v753_v21, %v745_v19  ;;  %v775_v28 = vpack.c.bf16 %v739_v22, %v731_v20 }
 0x1df   : > { %v782_v31 = vpack.c.bf16 %v754_v25, %v746_v23  ;;  %v776_v32 = vpack.c.bf16 %v740_v26, %v732_v24  ;;  %v614_v33 = vpop.f32.mrb[16].mxu1  ;;  %v657_v34 = vpop.f32.mrb[12].mxu0 }
 0x1e0   : > { %v615_v35 = vadd.f32 %v614_v33, %v2693_v62  ;;  %v658_v36 = vadd.f32 %v657_v34, %v2685_v48  ;;  %v616_v37 = vpop.f32.mrb[17].mxu1  ;;  %v659_v38 = vpop.f32.mrb[13].mxu0 }
 0x1e1   : > { %v617_v39 = vadd.f32 %v616_v37, %v2693_v62  ;;  %v660_v40 = vadd.f32 %v659_v38, %v2685_v48  ;;  %v618_v41 = vpop.f32.mrb[18].mxu1  ;;  %v661_v42 = vpop.f32.mrb[14].mxu0  ;;  %852 = vmatprep.subr.bf16.mxu0 %v782_v31  ;;  %923 = vmatprep.subr.bf16.mxu1 %v776_v32  ;;  %v766_v31 = vld [vmem:[%s3113_s2 + $0x58] sm:$0xff] }
 0x1e2   : > { %v619_v44 = vadd.f32 %v618_v41, %v2695_v63  ;;  %v662_v45 = vadd.f32 %v661_v42, %v2687_v50  ;;  %v620_v46 = vpop.f32.mrb[19].mxu1  ;;  %v663_v47 = vpop.f32.mrb[15].mxu0  ;;  %853 = vmatpush1.bf16.msra.mxu0 %v781_v27  ;;  %924 = vmatpush1.bf16.msra.mxu1 %v775_v28  ;;  %v747_v52 = vmax.f32 %v615_v35, 0.0  ;;  %v733_v53 = vmax.f32 %v658_v36, 0.0 }
 0x1e3   : > { %v621_v49 = vadd.f32 %v620_v46, %v2695_v63  ;;  %v664_v51 = vadd.f32 %v663_v47, %v2687_v50  ;;  %v748_v56 = vmax.f32 %v617_v39, 0.0  ;;  %v734_v57 = vmax.f32 %v660_v40, 0.0 }
 0x1e4   : > { %v755_v54 = vmax.f32 %v619_v44, 0.0  ;;  %v741_v55 = vmax.f32 %v662_v45, 0.0 }
 0x1e5   : > { %v756_v58 = vmax.f32 %v621_v49, 0.0  ;;  %v742_v59 = vmax.f32 %v664_v51, 0.0  ;;  %2278 = vmatmul.mubr.msk.bf16.vlgmr.msra.gmra.mrb[20].mxu0 %vm837_vm4, %v2715_v43  ;;  %v767_v49 = vld [vmem:[%s3113_s2 + $0x60] sm:$0xff] }
 0x1e6   : > { %v783_v60 = vpack.c.bf16 %v755_v54, %v747_v52  ;;  %v777_v61 = vpack.c.bf16 %v741_v55, %v733_v53  ;;  %892 = vmatprep.mubr.bf16.mxu0 %v2544_v5  ;;  %v2793_v54 = vpop.permute.xlu1 %804 }
 0x1e7   : > { %v784_v2 = vpack.c.bf16 %v756_v58, %v748_v56  ;;  %v778_v3 = vpack.c.bf16 %v742_v59, %v734_v57  ;;  %v667_v4 = vpop.f32.mrb[16].mxu0  ;;  %v710_v6 = vpop.f32.mrb[20].mxu1 }
 0x1e8   : > { %v668_v7 = vadd.f32 %v667_v4, %v2693_v62  ;;  %v711_v8 = vadd.f32 %v710_v6, %v2685_v48  ;;  %v669_v9 = vpop.f32.mrb[17].mxu0  ;;  %v712_v10 = vpop.f32.mrb[21].mxu1 }
 0x1e9   : > { %v670_v11 = vadd.f32 %v669_v9, %v2693_v62  ;;  %v713_v12 = vadd.f32 %v712_v10, %v2685_v48  ;;  %v671_v13 = vpop.f32.mrb[18].mxu0  ;;  %v714_v14 = vpop.f32.mrb[22].mxu1  ;;  %925 = vmatprep.subr.bf16.mxu1 %v784_v2  ;;  %996 = vmatprep.subr.bf16.mxu0 %v778_v3 }
 0x1ea   : > { %v672_v16 = vadd.f32 %v671_v13, %v2695_v63  ;;  %v715_v17 = vadd.f32 %v714_v14, %v2687_v50  ;;  %v673_v18 = vpop.f32.mrb[19].mxu0  ;;  %v716_v19 = vpop.f32.mrb[23].mxu1  ;;  %926 = vmatpush1.bf16.msra.mxu1 %v783_v60  ;;  %997 = vmatpush1.bf16.msra.mxu0 %v777_v61  ;;  %v749_v22 = vmax.f32 %v668_v7, 0.0  ;;  %v735_v48 = vmax.f32 %v711_v8, 0.0 }
 0x1eb   : > { %v674_v20 = vadd.f32 %v673_v18, %v2695_v63  ;;  %v717_v21 = vadd.f32 %v716_v19, %v2687_v50  ;;  %v750_v25 = vmax.f32 %v670_v11, 0.0  ;;  %v736_v26 = vmax.f32 %v713_v12, 0.0  ;;  %v765_v50 = vld [vmem:[%s3113_s2 + $0x50] sm:$0xff]  ;;  %v2801_v6 = vpop.permute.xlu1 %814 }
 0x1ec   : > { %v757_v23 = vmax.f32 %v672_v16, 0.0  ;;  %v743_v24 = vmax.f32 %v715_v17, 0.0  ;;  %v771_v39 = vpack.c.bf16 %v766_v31, %v765_v50 }
 0x1ed   : > { %v758_v27 = vmax.f32 %v674_v20, 0.0  ;;  %v744_v28 = vmax.f32 %v717_v21, 0.0  ;;  %2279 = vmatmul.mubr.msk.bf16.gmra.mrb[24].mxu0 %vm837_vm4, %v2734_v15  ;;  %2282 = vmatmul.mubr.msk.bf16.vlgmr.msra.gmra.mrb[28].mxu1 %vm837_vm4, %v2715_v43 }
 0x1ee   : > { %v785_v29 = vpack.c.bf16 %v757_v23, %v749_v22  ;;  %v779_v30 = vpack.c.bf16 %v743_v24, %v735_v48  ;;  %902 = vmatprep.mubr.bf16.mxu0 %v2544_v5  ;;  %965 = vmatprep.mubr.bf16.mxu1 %v2544_v5 }
 0x1ef   : > { %v786_v32 = vpack.c.bf16 %v758_v27, %v750_v25  ;;  %v780_v33 = vpack.c.bf16 %v744_v28, %v736_v26  ;;  %v720_v34 = vpop.f32.mrb[24].mxu1 }
 0x1f0   : > { %v721_v35 = vadd.f32 %v720_v34, %v2693_v62  ;;  %v722_v36 = vpop.f32.mrb[25].mxu1 }
 0x1f1   : > { %v723_v37 = vadd.f32 %v722_v36, %v2693_v62  ;;  %v724_v38 = vpop.f32.mrb[26].mxu1  ;;  %998 = vmatprep.subr.bf16.mxu0 %v786_v32  ;;  %1069 = vmatprep.subr.bf16.mxu1 %v780_v33  ;;  %v2813_v33 = vpop.permute.xlu1 %824 }
 0x1f2   : > { %v725_v40 = vadd.f32 %v724_v38, %v2695_v63  ;;  %v726_v41 = vpop.f32.mrb[27].mxu1  ;;  %999 = vmatpush1.bf16.msra.mxu0 %v785_v29  ;;  %1070 = vmatpush1.bf16.msra.mxu1 %v779_v30  ;;  %v751_v44 = vmax.f32 %v721_v35, 0.0 }
 0x1f3   : > { %v727_v42 = vadd.f32 %v726_v41, %v2695_v63  ;;  %v752_v46 = vmax.f32 %v723_v37, 0.0  ;;  %v768_v63 = vld [vmem:[%s3113_s2 + $0x68] sm:$0xff] }
 0x1f4   : > { %v759_v45 = vmax.f32 %v725_v40, 0.0  ;;  %v772_v52 = vpack.c.bf16 %v768_v63, %v767_v49 }
 0x1f5   : > { %v760_v47 = vmax.f32 %v727_v42, 0.0  ;;  %2280 = vmatmul.mubr.msk.bf16.gmra.mrb[28].mxu0 %vm837_vm4, %v771_v39  ;;  %2283 = vmatmul.mubr.msk.bf16.gmra.mrb[32].mxu1 %vm837_vm4, %v2734_v15 }
 0x1f6   : > { %v787_v62 = vpack.c.bf16 %v759_v45, %v751_v44  ;;  %912 = vmatprep.mubr.bf16.mxu0 %v2544_v5  ;;  %975 = vmatprep.mubr.bf16.mxu1 %v2544_v5 }
 0x1f7   : > { %v788_v51 = vpack.c.bf16 %v760_v47, %v752_v46 }
 0x1f9   : > { %1071 = vmatprep.subr.bf16.mxu1 %v788_v51 }
 0x1fa   : > { %1072 = vmatpush1.bf16.msra.mxu1 %v787_v62 }
 0x1fd   : > { %2281 = vmatmul.mubr.msk.bf16.gmra.mrb[32].mxu0 %vm837_vm4, %v772_v52  ;;  %2284 = vmatmul.mubr.msk.bf16.gmra.mrb[36].mxu1 %vm837_vm4, %v771_v39 }
 0x1fe   : > { %985 = vmatprep.mubr.bf16.mxu1 %v2544_v5  ;;  %1028 = vmatprep.mubr.bf16.mxu0 %v2544_v5 }
 0x205   : > { %2285 = vmatmul.mubr.msk.bf16.gmra.mrb[40].mxu1 %vm837_vm4, %v772_v52  ;;  %2286 = vmatmul.mubr.msk.bf16.vlgmr.msra.gmra.mrb[36].mxu0 %vm837_vm4, %v2715_v43 }
 0x206   : > { %1038 = vmatprep.mubr.bf16.mxu0 %v2544_v5  ;;  %1101 = vmatprep.mubr.bf16.mxu1 %v2544_v5 }
 0x20d   : > { %2287 = vmatmul.mubr.msk.bf16.gmra.mrb[40].mxu0 %vm837_vm4, %v2734_v15  ;;  %2290 = vmatmul.mubr.msk.bf16.vlgmr.msra.gmra.mrb[44].mxu1 %vm837_vm4, %v2715_v43  ;;  %v2791_v43 = vpop.permute.xlu0 %799 }
 0x20e   : > { %1048 = vmatprep.mubr.bf16.mxu0 %v2544_v5  ;;  %1111 = vmatprep.mubr.bf16.mxu1 %v2544_v5 }
 0x211   : > { %v2799_v4 = vpop.permute.xlu0 %809 }
 0x215   : > { %2288 = vmatmul.mubr.msk.bf16.gmra.mrb[44].mxu0 %vm837_vm4, %v771_v39  ;;  %2291 = vmatmul.mubr.msk.bf16.gmra.mrb[48].mxu1 %vm837_vm4, %v2734_v15  ;;  %v2811_v32 = vpop.permute.xlu0 %819 }
 0x216   : > { %1058 = vmatprep.mubr.bf16.mxu0 %v2544_v5  ;;  %1121 = vmatprep.mubr.bf16.mxu1 %v2544_v5 }
 0x21d   : > { %2289 = vmatmul.mubr.msk.bf16.gmra.mrb[48].mxu0 %vm837_vm4, %v772_v52  ;;  %2292 = vmatmul.mubr.msk.bf16.gmra.mrb[52].mxu1 %vm837_vm4, %v771_v39 }
 0x21e   : > { %1131 = vmatprep.mubr.bf16.mxu1 %v2544_v5 }
 0x225   : > { %2293 = vmatmul.mubr.msk.bf16.gmra.mrb[56].mxu1 %vm837_vm4, %v772_v52 }
 0x2b8   : > { %v884_v53 = vpop.f32.mrb[20].mxu0 }
 0x2b9   : > { %v885_v55 = vadd.f32 %v884_v53, %v2791_v43  ;;  %v886_v56 = vpop.f32.mrb[21].mxu0 }
 0x2ba   : > { %v887_v57 = vadd.f32 %v886_v56, %v2791_v43  ;;  %v888_v58 = vpop.f32.mrb[22].mxu0 }
 0x2bb   : > { %v1142_v59 = vmax.f32 %v885_v55, 0.0  ;;  %v889_v60 = vadd.f32 %v888_v58, %v2793_v54  ;;  %v890_v61 = vpop.f32.mrb[23].mxu0 }
 0x2bc   : > { %v1143_v0 = vmax.f32 %v887_v57, 0.0  ;;  %v891_v5 = vadd.f32 %v890_v61, %v2793_v54 }
 0x2bd   : > { %v1150_v1 = vmax.f32 %v889_v60, 0.0 }
 0x2be   : > { %v1206_v2 = vmax.f32 %v1142_v59, %v1143_v0  ;;  %v1151_v3 = vmax.f32 %v891_v5, 0.0 }
 0x2c0   : > { %v1215_v7 = vmax.f32 %v1150_v1, %v1151_v3  ;;  %v894_v8 = vpop.f32.mrb[24].mxu0  ;;  %v957_v9 = vpop.f32.mrb[28].mxu1 }
 0x2c1   : > { %v895_v10 = vadd.f32 %v894_v8, %v2799_v4  ;;  %v958_v11 = vadd.f32 %v957_v9, %v2791_v43  ;;  %v896_v12 = vpop.f32.mrb[25].mxu0  ;;  %v959_v13 = vpop.f32.mrb[29].mxu1 }
 0x2c2   : > { %v897_v14 = vadd.f32 %v896_v12, %v2799_v4  ;;  %v960_v15 = vadd.f32 %v959_v13, %v2791_v43  ;;  %v898_v16 = vpop.f32.mrb[26].mxu0  ;;  %v961_v17 = vpop.f32.mrb[30].mxu1 }
 0x2c3   : > { %v1158_v18 = vmax.f32 %v895_v10, 0.0  ;;  %v1144_v19 = vmax.f32 %v958_v11, 0.0  ;;  %v899_v20 = vadd.f32 %v898_v16, %v2801_v6  ;;  %v962_v21 = vadd.f32 %v961_v17, %v2793_v54  ;;  %v900_v22 = vpop.f32.mrb[27].mxu0  ;;  %v963_v48 = vpop.f32.mrb[31].mxu1 }
 0x2c4   : > { %v1159_v23 = vmax.f32 %v897_v14, 0.0  ;;  %v1145_v24 = vmax.f32 %v960_v15, 0.0  ;;  %v901_v25 = vadd.f32 %v900_v22, %v2801_v6  ;;  %v964_v26 = vadd.f32 %v963_v48, %v2793_v54  ;;  %v2827_v3 = vpop.permute.xlu0 %829 }
 0x2c5   : > { %v1207_v27 = vmax.f32 %v1206_v2, %v1144_v19  ;;  %v1166_v28 = vmax.f32 %v899_v20, 0.0  ;;  %v1152_v29 = vmax.f32 %v962_v21, 0.0 }
 0x2c6   : > { %v1224_v30 = vmax.f32 %v1158_v18, %v1159_v23  ;;  %v1167_v50 = vmax.f32 %v901_v25, 0.0  ;;  %v1153_v31 = vmax.f32 %v964_v26, 0.0 }
 0x2c7   : > { %v2815_v34 = vmax.f32 %v1207_v27, %v1145_v24  ;;  %v1216_v35 = vmax.f32 %v1215_v7, %v1152_v29  ;;  %v2829_v7 = vpop.permute.xlu1 %834 }
 0x2c8   : > { %v1233_v36 = vmax.f32 %v1166_v28, %v1167_v50  ;;  %v904_v37 = vpop.f32.mrb[28].mxu0  ;;  %v967_v38 = vpop.f32.mrb[32].mxu1 }
 0x2c9   : > { %v2817_v39 = vmax.f32 %v1216_v35, %v1153_v31  ;;  %v905_v40 = vadd.f32 %v904_v37, %v2811_v32  ;;  %v968_v41 = vadd.f32 %v967_v38, %v2799_v4  ;;  %v906_v42 = vpop.f32.mrb[29].mxu0  ;;  %v969_v44 = vpop.f32.mrb[33].mxu1 }
 0x2ca   : > { %v907_v45 = vadd.f32 %v906_v42, %v2811_v32  ;;  %v970_v46 = vadd.f32 %v969_v44, %v2799_v4  ;;  %v908_v47 = vpop.f32.mrb[30].mxu0  ;;  %v971_v62 = vpop.f32.mrb[34].mxu1 }
 0x2cb   : > { %v1174_v49 = vmax.f32 %v905_v40, 0.0  ;;  %v1160_v63 = vmax.f32 %v968_v41, 0.0  ;;  %v909_v51 = vadd.f32 %v908_v47, %v2813_v33  ;;  %v972_v52 = vadd.f32 %v971_v62, %v2801_v6  ;;  %v910_v53 = vpop.f32.mrb[31].mxu0  ;;  %v973_v55 = vpop.f32.mrb[35].mxu1 }
 0x2cc   : > { %v1175_v56 = vmax.f32 %v907_v45, 0.0  ;;  %v1161_v57 = vmax.f32 %v970_v46, 0.0  ;;  %v911_v58 = vadd.f32 %v910_v53, %v2813_v33  ;;  %v974_v59 = vadd.f32 %v973_v55, %v2801_v6 }
 0x2cd   : > { %v1225_v60 = vmax.f32 %v1224_v30, %v1160_v63  ;;  %v1182_v61 = vmax.f32 %v909_v51, 0.0  ;;  %v1168_v0 = vmax.f32 %v972_v52, 0.0 }
 0x2ce   : > { %v1242_v5 = vmax.f32 %v1174_v49, %v1175_v56  ;;  %v1183_v1 = vmax.f32 %v911_v58, 0.0  ;;  %v1169_v2 = vmax.f32 %v974_v59, 0.0 }
 0x2cf   : > { %v2831_v8 = vmax.f32 %v1225_v60, %v1161_v57  ;;  %v1234_v9 = vmax.f32 %v1233_v36, %v1168_v0 }
 0x2d0   : > { %v1251_v10 = vmax.f32 %v1182_v61, %v1183_v1  ;;  %v914_v11 = vpop.f32.mrb[32].mxu0  ;;  %v977_v12 = vpop.f32.mrb[36].mxu1 }
 0x2d1   : > { %v2833_v13 = vmax.f32 %v1234_v9, %v1169_v2  ;;  %v915_v14 = vadd.f32 %v914_v11, %v2827_v3  ;;  %v978_v15 = vadd.f32 %v977_v12, %v2811_v32  ;;  %v916_v16 = vpop.f32.mrb[33].mxu0  ;;  %v979_v17 = vpop.f32.mrb[37].mxu1 }
 0x2d2   : > { %v917_v18 = vadd.f32 %v916_v16, %v2827_v3  ;;  %v980_v19 = vadd.f32 %v979_v17, %v2811_v32  ;;  %v918_v20 = vpop.f32.mrb[34].mxu0  ;;  %v981_v21 = vpop.f32.mrb[38].mxu1 }
 0x2d3   : > { %v1190_v22 = vmax.f32 %v915_v14, 0.0  ;;  %v1176_v48 = vmax.f32 %v978_v15, 0.0  ;;  %v919_v23 = vadd.f32 %v918_v20, %v2829_v7  ;;  %v982_v24 = vadd.f32 %v981_v21, %v2813_v33  ;;  %v920_v25 = vpop.f32.mrb[35].mxu0  ;;  %v983_v26 = vpop.f32.mrb[39].mxu1 }
 0x2d4   : > { %v1191_v27 = vmax.f32 %v917_v18, 0.0  ;;  %v1177_v28 = vmax.f32 %v980_v19, 0.0  ;;  %v921_v29 = vadd.f32 %v920_v25, %v2829_v7  ;;  %v984_v30 = vadd.f32 %v983_v26, %v2813_v33 }
 0x2d5   : > { %v1243_v50 = vmax.f32 %v1242_v5, %v1176_v48  ;;  %v1198_v31 = vmax.f32 %v919_v23, 0.0  ;;  %v1184_v35 = vmax.f32 %v982_v24, 0.0 }
 0x2d6   : > { %v1260_v36 = vmax.f32 %v1190_v22, %v1191_v27  ;;  %v1199_v37 = vmax.f32 %v921_v29, 0.0  ;;  %v1185_v38 = vmax.f32 %v984_v30, 0.0 }
 0x2d7   : > { %v2843_v40 = vmax.f32 %v1243_v50, %v1177_v28  ;;  %v1252_v41 = vmax.f32 %v1251_v10, %v1184_v35 }
 0x2d8   : > { %v1269_v42 = vmax.f32 %v1198_v31, %v1199_v37  ;;  %v987_v44 = vpop.f32.mrb[40].mxu1  ;;  %v1030_v45 = vpop.f32.mrb[36].mxu0 }
 0x2d9   : > { %v2845_v46 = vmax.f32 %v1252_v41, %v1185_v38  ;;  %v988_v47 = vadd.f32 %v987_v44, %v2827_v3  ;;  %v1031_v62 = vadd.f32 %v1030_v45, %v2791_v43  ;;  %v989_v49 = vpop.f32.mrb[41].mxu1  ;;  %v1032_v63 = vpop.f32.mrb[37].mxu0 }
 0x2da   : > { %v990_v51 = vadd.f32 %v989_v49, %v2827_v3  ;;  %v1033_v52 = vadd.f32 %v1032_v63, %v2791_v43  ;;  %v991_v53 = vpop.f32.mrb[42].mxu1  ;;  %v1034_v55 = vpop.f32.mrb[38].mxu0 }
 0x2db   : > { %v1192_v56 = vmax.f32 %v988_v47, 0.0  ;;  %v1146_v57 = vmax.f32 %v1031_v62, 0.0  ;;  %v992_v58 = vadd.f32 %v991_v53, %v2829_v7  ;;  %v1035_v59 = vadd.f32 %v1034_v55, %v2793_v54  ;;  %v993_v60 = vpop.f32.mrb[43].mxu1  ;;  %v1036_v61 = vpop.f32.mrb[39].mxu0 }
 0x2dc   : > { %v1193_v0 = vmax.f32 %v990_v51, 0.0  ;;  %v1147_v5 = vmax.f32 %v1033_v52, 0.0  ;;  %v994_v1 = vadd.f32 %v993_v60, %v2829_v7  ;;  %v1037_v2 = vadd.f32 %v1036_v61, %v2793_v54 }
 0x2dd   : > { %v1261_v9 = vmax.f32 %v1260_v36, %v1192_v56  ;;  %v1209_v10 = vmax.f32 %v2815_v34, %v1146_v57  ;;  %v1200_v11 = vmax.f32 %v992_v58, 0.0  ;;  %v1154_v12 = vmax.f32 %v1035_v59, 0.0 }
 0x2de   : > { %v1201_v14 = vmax.f32 %v994_v1, 0.0  ;;  %v1155_v15 = vmax.f32 %v1037_v2, 0.0 }
 0x2df   : > { %v2856_v16 = vmax.f32 %v1261_v9, %v1193_v0  ;;  %v1210_v17 = vmax.f32 %v1209_v10, %v1147_v5  ;;  %v1270_v18 = vmax.f32 %v1269_v42, %v1200_v11  ;;  %v1218_v19 = vmax.f32 %v2817_v39, %v1154_v12 }
 0x2e0   : > { %v1040_v20 = vpop.f32.mrb[40].mxu0  ;;  %v1103_v21 = vpop.f32.mrb[44].mxu1 }
 0x2e1   : > { %v2859_v22 = vmax.f32 %v1270_v18, %v1201_v14  ;;  %v1219_v48 = vmax.f32 %v1218_v19, %v1155_v15  ;;  %v1041_v23 = vadd.f32 %v1040_v20, %v2799_v4  ;;  %v1104_v24 = vadd.f32 %v1103_v21, %v2791_v43  ;;  %v1042_v34 = vpop.f32.mrb[41].mxu0  ;;  %v1105_v25 = vpop.f32.mrb[45].mxu1 }
 0x2e2   : > { %v1043_v26 = vadd.f32 %v1042_v34, %v2799_v4  ;;  %v1106_v27 = vadd.f32 %v1105_v25, %v2791_v43  ;;  %v1044_v28 = vpop.f32.mrb[42].mxu0  ;;  %v1107_v29 = vpop.f32.mrb[46].mxu1 }
 0x2e3   : > { %v1162_v30 = vmax.f32 %v1041_v23, 0.0  ;;  %v1148_v50 = vmax.f32 %v1104_v24, 0.0  ;;  %v1045_v39 = vadd.f32 %v1044_v28, %v2801_v6  ;;  %v1108_v31 = vadd.f32 %v1107_v29, %v2793_v54  ;;  %v1046_v35 = vpop.f32.mrb[43].mxu0  ;;  %v1109_v36 = vpop.f32.mrb[47].mxu1 }
 0x2e4   : > { %v1163_v37 = vmax.f32 %v1043_v26, 0.0  ;;  %v1149_v38 = vmax.f32 %v1106_v27, 0.0  ;;  %v1047_v41 = vadd.f32 %v1046_v35, %v2801_v6  ;;  %v1110_v42 = vadd.f32 %v1109_v36, %v2793_v54 }
 0x2e5   : > { %v1227_v44 = vmax.f32 %v2831_v8, %v1162_v30  ;;  %v1211_v45 = vmax.f32 %v1210_v17, %v1148_v50  ;;  %v1170_v43 = vmax.f32 %v1045_v39, 0.0  ;;  %v1156_v47 = vmax.f32 %v1108_v31, 0.0 }
 0x2e6   : > { %v1171_v62 = vmax.f32 %v1047_v41, 0.0  ;;  %v1157_v49 = vmax.f32 %v1110_v42, 0.0 }
 0x2e7   : > { %v1228_v63 = vmax.f32 %v1227_v44, %v1163_v37  ;;  %v1236_v51 = vmax.f32 %v2833_v13, %v1170_v43  ;;  %v1220_v52 = vmax.f32 %v1219_v48, %v1156_v47  ;;  %v1212_v53 = vmax.f32 %v1211_v45, %v1149_v38 }
 0x2e8   : > { %v1050_v55 = vpop.f32.mrb[44].mxu0  ;;  %v1113_v56 = vpop.f32.mrb[48].mxu1 }
 0x2e9   : > { %v1237_v57 = vmax.f32 %v1236_v51, %v1171_v62  ;;  %v1051_v58 = vadd.f32 %v1050_v55, %v2811_v32  ;;  %v1114_v59 = vadd.f32 %v1113_v56, %v2799_v4  ;;  %v1052_v54 = vpop.f32.mrb[45].mxu0  ;;  %v1115_v60 = vpop.f32.mrb[49].mxu1  ;;  %1213 = vmax.xlane.f32.xlu0 %v1212_v53  ;;  %v1221_v8 = vmax.f32 %v1220_v52, %v1157_v49 }
 0x2ea   : > { %v1053_v61 = vadd.f32 %v1052_v54, %v2811_v32  ;;  %v1116_v0 = vadd.f32 %v1115_v60, %v2799_v4  ;;  %v1054_v5 = vpop.f32.mrb[46].mxu0  ;;  %v1117_v1 = vpop.f32.mrb[50].mxu1 }
 0x2eb   : > { %v1178_v13 = vmax.f32 %v1051_v58, 0.0  ;;  %v1164_v2 = vmax.f32 %v1114_v59, 0.0  ;;  %v1055_v9 = vadd.f32 %v1054_v5, %v2813_v33  ;;  %v1118_v10 = vadd.f32 %v1117_v1, %v2801_v6  ;;  %v1056_v11 = vpop.f32.mrb[47].mxu0  ;;  %v1119_v12 = vpop.f32.mrb[51].mxu1  ;;  %1222 = vmax.xlane.f32.xlu1 %v1221_v8 }
 0x2ec   : > { %v1179_v14 = vmax.f32 %v1053_v61, 0.0  ;;  %v1165_v15 = vmax.f32 %v1116_v0, 0.0  ;;  %v1057_v17 = vadd.f32 %v1056_v11, %v2813_v33  ;;  %v1120_v18 = vadd.f32 %v1119_v12, %v2801_v6 }
 0x2ed   : > { %v1245_v19 = vmax.f32 %v2843_v40, %v1178_v13  ;;  %v1229_v4 = vmax.f32 %v1228_v63, %v1164_v2  ;;  %v1186_v20 = vmax.f32 %v1055_v9, 0.0  ;;  %v1172_v21 = vmax.f32 %v1118_v10, 0.0 }
 0x2ee   : > { %v1187_v48 = vmax.f32 %v1057_v17, 0.0  ;;  %v1173_v23 = vmax.f32 %v1120_v18, 0.0 }
 0x2ef   : > { %v1246_v24 = vmax.f32 %v1245_v19, %v1179_v14  ;;  %v1254_v34 = vmax.f32 %v2845_v46, %v1186_v20  ;;  %v1238_v25 = vmax.f32 %v1237_v57, %v1172_v21  ;;  %v1230_v26 = vmax.f32 %v1229_v4, %v1165_v15 }
 0x2f0   : > { %v1060_v27 = vpop.f32.mrb[48].mxu0  ;;  %v1123_v28 = vpop.f32.mrb[52].mxu1 }
 0x2f1   : > { %v1255_v29 = vmax.f32 %v1254_v34, %v1187_v48  ;;  %v1061_v30 = vadd.f32 %v1060_v27, %v2827_v3  ;;  %v1124_v50 = vadd.f32 %v1123_v28, %v2811_v32  ;;  %v1062_v6 = vpop.f32.mrb[49].mxu0  ;;  %v1125_v39 = vpop.f32.mrb[53].mxu1  ;;  %1231 = vmax.xlane.f32.xlu0 %v1230_v26  ;;  %v1239_v40 = vmax.f32 %v1238_v25, %v1173_v23  ;;  %v1279_v26 = vld [vmem:[%s3113_s2 + $0x78] sm:$0xff]  ;;  %v1280_v27 = vld [vmem:[%s3113_s2 + $0x80] sm:$0xff]  ;;  %v1281_v28 = vld [vmem:[%s3113_s2 + $0x88] sm:$0xff] }
 0x2f2   : > { %v1063_v31 = vadd.f32 %v1062_v6, %v2827_v3  ;;  %v1126_v35 = vadd.f32 %v1125_v39, %v2811_v32  ;;  %v1064_v36 = vpop.f32.mrb[50].mxu0  ;;  %v1127_v37 = vpop.f32.mrb[54].mxu1  ;;  %v1285_v6 = vld [vmem:[%s3113_s2 + $0xa8] sm:$0xff]  ;;  %v1432_v39 = vld [vmem:[%s3113_s2 + $0xb0] sm:$0xff] }
 0x2f3   : > { %v1194_v46 = vmax.f32 %v1061_v30, 0.0  ;;  %v1180_v38 = vmax.f32 %v1124_v50, 0.0  ;;  %v1065_v41 = vadd.f32 %v1064_v36, %v2829_v7  ;;  %v1128_v42 = vadd.f32 %v1127_v37, %v2813_v33  ;;  %v1066_v44 = vpop.f32.mrb[51].mxu0  ;;  %v1129_v45 = vpop.f32.mrb[55].mxu1  ;;  %v1283_v30 = vld [vmem:[%s3113_s2 + $0x98] sm:$0xff]  ;;  %v1284_v50 = vld [vmem:[%s3113_s2 + $0xa0] sm:$0xff]  ;;  %2421 = vmatprep.mubr.msk.f32.mxu1 %vm1294_vm5, %v1432_v39 }
 0x2f4   : > { %v1195_v43 = vmax.f32 %v1063_v31, 0.0  ;;  %v1181_v47 = vmax.f32 %v1126_v35, 0.0  ;;  %v1067_v62 = vadd.f32 %v1066_v44, %v2829_v7  ;;  %v1130_v49 = vadd.f32 %v1129_v45, %v2813_v33  ;;  %v1286_v31 = vld [vmem:[%s3114_s3 + $0x70] sm:$0xff]  ;;  %v1541_v39 = vld [vmem:[%s3113_s2 + $0xe8] sm:$0xff] }
 0x2f5   : > { %v1263_v63 = vmax.f32 %v2856_v16, %v1194_v46  ;;  %v1247_v51 = vmax.f32 %v1246_v24, %v1180_v38  ;;  %v1202_v32 = vmax.f32 %v1065_v41, 0.0  ;;  %v1188_v52 = vmax.f32 %v1128_v42, 0.0  ;;  %1240 = vmax.xlane.f32.xlu0 %v1239_v40  ;;  %v1287_v40 = vld [vmem:[%s3114_s3 + $0x78] sm:$0xff]  ;;  %v1289_v38 = vld [vmem:[%s3114_s3 + $0x88] sm:$0xff]  ;;  %v1288_v42 = vld [vmem:[%s3114_s3 + $0x80] sm:$0xff] }
 0x2f6   : > { %v1203_v53 = vmax.f32 %v1067_v62, 0.0  ;;  %v1189_v55 = vmax.f32 %v1130_v49, 0.0 }
 0x2f7   : > { %v1264_v56 = vmax.f32 %v1263_v63, %v1195_v43  ;;  %v1272_v57 = vmax.f32 %v2859_v22, %v1202_v32  ;;  %v1256_v58 = vmax.f32 %v1255_v29, %v1188_v52  ;;  %v1248_v59 = vmax.f32 %v1247_v51, %v1181_v47  ;;  %v1282_v29 = vld [vmem:[%s3113_s2 + $0x90] sm:$0xff]  ;;  %v1291_v63 = vld [vmem:[%s3114_s3 + $0x98] sm:$0xff] }
 0x2f8   : > { %v1133_v54 = vpop.f32.mrb[56].mxu1  ;;  %v1290_v32 = vld [vmem:[%s3114_s3 + $0x90] sm:$0xff] }
 0x2f9   : > { %v1273_v60 = vmax.f32 %v1272_v57, %v1203_v53  ;;  %v1134_v8 = vadd.f32 %v1133_v54, %v2827_v3  ;;  %v1135_v61 = vpop.f32.mrb[57].mxu1  ;;  %1249 = vmax.xlane.f32.xlu1 %v1248_v59  ;;  %v1257_v33 = vmax.f32 %v1256_v58, %v1189_v55  ;;  %v1293_v59 = vld [vmem:[%s3114_s3 + $0xa8] sm:$0xff] }
 0x2fa   : > { %v1136_v16 = vadd.f32 %v1135_v61, %v2827_v3  ;;  %v1137_v0 = vpop.f32.mrb[58].mxu1  ;;  %v1278_v3 = vld [vmem:[%s3113_s2 + $0x70] sm:$0xff] }
 0x2fb   : > { %v1196_v5 = vmax.f32 %v1134_v8, 0.0  ;;  %v1138_v1 = vadd.f32 %v1137_v0, %v2829_v7  ;;  %v1139_v13 = vpop.f32.mrb[59].mxu1  ;;  %1258 = vmax.xlane.f32.xlu0 %v1257_v33  ;;  %2393 = vmatprep.mubr.msk.f32.mxu0 %vm1294_vm5, %v1278_v3  ;;  %v1643_v3 = vld [vmem:[%s3113_s2 + $0xf0] sm:$0xff] }
 0x2fc   : > { %v1197_v2 = vmax.f32 %v1136_v16, 0.0  ;;  %v1140_v22 = vadd.f32 %v1139_v13, %v2829_v7 }
 0x2fd   : > { %v1265_v9 = vmax.f32 %v1264_v56, %v1196_v5  ;;  %v1204_v10 = vmax.f32 %v1138_v1, 0.0 }
 0x2fe   : > { %v1205_v11 = vmax.f32 %v1140_v22, 0.0  ;;  %v1433_v22 = vld [vmem:[%s3113_s2 + $0xb8] sm:$0xff] }
 0x2ff   : > { %v1274_v12 = vmax.f32 %v1273_v60, %v1204_v10  ;;  %v1266_v14 = vmax.f32 %v1265_v9, %v1197_v2  ;;  %v1292_v60 = vld [vmem:[%s3114_s3 + $0xa0] sm:$0xff]  ;;  %v1435_v10 = vld [vmem:[%s3113_s2 + $0xc8] sm:$0xff] }
 0x300   : > { %v1434_v9 = vld [vmem:[%s3113_s2 + $0xc0] sm:$0xff] }
 0x301   : > { %1267 = vmax.xlane.f32.xlu1 %v1266_v14  ;;  %v1275_v15 = vmax.f32 %v1274_v12, %v1205_v11  ;;  %v1538_v11 = vld [vmem:[%s3113_s2 + $0xd0] sm:$0xff]  ;;  %v2310_v12 = vld.sshfl [vmem:[%s3112_s1] sm:$0x33 pattern:$0x76325410] }
 0x302   : > { %v1675_v14 = vcombine.high %v2310_v12, %v2310_v12 }
 0x303   : > { %1276 = vmax.xlane.f32.xlu0 %v1275_v15  ;;  %v2546_v15 = vmov 0.0  }
 0x376   : > { %v1214_v17 = vpop.xlane.xlu0 %1213 }
 0x378   : > { %v1223_v18 = vpop.xlane.xlu1 %1222 }
 0x379   : > { %v2455_v19 = vpack.c.bf16 %v1223_v18, %v1214_v17  ;;  %v1644_v17 = vld [vmem:[%s3113_s2 + $0xf8] sm:$0xff]  ;;  %v1645_v18 = vld [vmem:[%s3113_s2 + $0x100] sm:$0xff] }
 0x37b   : > { %2456 = vmatprep.subr.bf16.mxu0 %v2455_v19 }
 0x37c   : > { %2458 = vmatpush3.bf16.msra.mxu0 %v2455_v19  ;;  %v1646_v19 = vld [vmem:[%s3113_s2 + $0x108] sm:$0xff] }
 0x37e   : > { %v1232_v7 = vpop.xlane.xlu0 %1231 }
 0x382   : > { %v1241_v4 = vpop.xlane.xlu0 %1240 }
 0x383   : > { %v2459_v20 = vpack.c.bf16 %v1241_v4, %v1232_v7  ;;  %v1437_v7 = vld [vmem:[%s3114_s3 + $0xb8] sm:$0xff]  ;;  %v1436_v4 = vld [vmem:[%s3114_s3 + $0xb0] sm:$0xff] }
 0x385   : > { %2460 = vmatprep.subr.bf16.mxu0 %v2459_v20 }
 0x386   : > { %2462 = vmatpush3.bf16.msra.mxu0 %v2459_v20  ;;  %v1250_v21 = vpop.xlane.xlu1 %1249 }
 0x388   : > { %v1259_v48 = vpop.xlane.xlu0 %1258 }
 0x389   : > { %v2463_v23 = vpack.c.bf16 %v1259_v48, %v1250_v21 }
 0x38b   : > { %2464 = vmatprep.subr.bf16.mxu0 %v2463_v23 }
 0x38c   : > { %2466 = vmatpush3.bf16.msra.mxu0 %v2463_v23 }
 0x38e   : > { %v1268_v24 = vpop.xlane.xlu1 %1267 }
 0x390   : > { %v1277_v34 = vpop.xlane.xlu0 %1276 }
 0x391   : > { %v2467_v25 = vpack.c.bf16 %v1277_v34, %v1268_v24  ;;  %v1439_v24 = vld [vmem:[%s3114_s3 + $0xc8] sm:$0xff]  ;;  %v1438_v34 = vld [vmem:[%s3114_s3 + $0xc0] sm:$0xff] }
 0x393   : > { %2468 = vmatprep.subr.bf16.mxu0 %v2467_v25 }
 0x394   : > { %2470 = vmatpush3.bf16.msra.mxu0 %v2467_v25 }
 0x395   : > { %2311 = vmatprep.subr.msk.mxu0 %vm257_vm1, %v1675_v14 }
 0x397   : > { %2394 = vmatmul.mubr.msk.f32.vlgmr.msra.gmra.mrb[52].mxu0 %vm1294_vm5, %v1279_v26 }
 0x398   : > { %2396 = vmatprep.mubr.msk.f32.mxu0 %vm1294_vm5, %v1280_v27  ;;  %2312 = vmatpush1.msk.msra.mxu0 %vm257_vm1, %v2310_v12 }
 0x39b   : > { %2397 = vmatmul.mubr.msk.f32.gmra.mrb[54].mxu0 %vm1294_vm5, %v1281_v28 }
 0x39c   : > { %2399 = vmatprep.mubr.msk.f32.mxu0 %vm1294_vm5, %v1282_v29 }
 0x39f   : > { %2400 = vmatmul.mubr.msk.f32.gmra.mrb[56].mxu0 %vm1294_vm5, %v1283_v30 }
 0x3a0   : > { %2402 = vmatprep.mubr.msk.f32.mxu0 %vm1294_vm5, %v1284_v50  ;;  %v1539_v50 = vld [vmem:[%s3113_s2 + $0xd8] sm:$0xff] }
 0x3a3   : > { %2403 = vmatmul.mubr.msk.f32.gmra.mrb[58].mxu0 %vm1294_vm5, %v1285_v6  ;;  %v1540_v6 = vld [vmem:[%s3113_s2 + $0xe0] sm:$0xff] }
 0x3a4   : > { %1757 = vmatprep.mubr.f32.mxu0 %v2546_v15 }
 0x3a7   : > { %2313 = vmatmul.mubr.msk.f32.vlgmr.msra.gmra.mrb[60].mxu0 %vm1676_vm6, %v1643_v3 }
 0x3a8   : > { %1763 = vmatprep.mubr.f32.mxu0 %v2546_v15 }
 0x3ab   : > { %2314 = vmatmul.mubr.msk.f32.gmra.mrb[62].mxu0 %vm1676_vm6, %v1644_v17 }
 0x3ac   : > { %1769 = vmatprep.mubr.f32.mxu0 %v2546_v15 }
 0x3af   : > { %2315 = vmatmul.mubr.msk.f32.gmra.mrb[64].mxu0 %vm1676_vm6, %v1645_v18 }
 0x3b0   : > { %1775 = vmatprep.mubr.f32.mxu0 %v2546_v15 }
 0x3b3   : > { %2316 = vmatmul.mubr.msk.f32.gmra.mrb[66].mxu0 %vm1676_vm6, %v1646_v19  ;;  %v1790_v19 = vld [vmem:[%s3113_s2 + $0x110] sm:$0x7] }
 0x3b4   : > { %2083 = vmatprep.mubr.f32.mxu0 %v2546_v15 }
 0x46a   : > { %v2395_v35 = vpop.f32.mrb[52].mxu0 }
 0x46b   : > { %v1391_v36 = vadd.f32 %v2395_v35, %v1287_v40  ;;  %v1385_v37 = vpop.f32.mrb[53].mxu0 }
 0x46c   : > { %v1386_v46 = vadd.f32 %v1385_v37, %v1286_v31  ;;  %v1543_v37 = vld [vmem:[%s3114_s3 + $0xd8] sm:$0xff] }
 0x46d   : > { %v1425_v41 = vmax.f32 %v1391_v36, 0.0 }
 0x46e   : > { %v1424_v44 = vmax.f32 %v1386_v46, 0.0  ;;  %v2398_v45 = vpop.f32.mrb[54].mxu0  ;;  %v1542_v46 = vld [vmem:[%s3114_s3 + $0xd0] sm:$0xff] }
 0x46f   : > { %v1401_v43 = vadd.f32 %v2398_v45, %v1289_v38  ;;  %v1395_v47 = vpop.f32.mrb[55].mxu0  ;;  %v1544_v45 = vld [vmem:[%s3114_s3 + $0xe0] sm:$0xff] }
 0x470   : > { %v2471_v62 = vpack.c.bf16 %v1425_v41, %v1424_v44  ;;  %v1396_v49 = vadd.f32 %v1395_v47, %v1288_v42  ;;  %v1791_v47 = vld [vmem:[%s3114_s3 + $0x110] sm:$0x7] }
 0x471   : > { %v1427_v51 = vmax.f32 %v1401_v43, 0.0 }
 0x472   : > { %v1426_v52 = vmax.f32 %v1396_v49, 0.0  ;;  %v2401_v53 = vpop.f32.mrb[56].mxu0  ;;  %2472 = vmatprep.subr.bf16.mxu1 %v2471_v62 }
 0x473   : > { %v1411_v55 = vadd.f32 %v2401_v53, %v1291_v63  ;;  %v1405_v56 = vpop.f32.mrb[57].mxu0  ;;  %2474 = vmatpush3.bf16.msra.mxu1 %v2471_v62 }
 0x474   : > { %v2475_v57 = vpack.c.bf16 %v1427_v51, %v1426_v52  ;;  %v1406_v58 = vadd.f32 %v1405_v56, %v1290_v32  ;;  %v1545_v32 = vld [vmem:[%s3114_s3 + $0xe8] sm:$0xff] }
 0x475   : > { %v1429_v54 = vmax.f32 %v1411_v55, 0.0 }
 0x476   : > { %v1428_v8 = vmax.f32 %v1406_v58, 0.0  ;;  %v2404_v61 = vpop.f32.mrb[58].mxu0  ;;  %2476 = vmatprep.subr.bf16.mxu1 %v2475_v57 }
 0x477   : > { %v1421_v33 = vadd.f32 %v2404_v61, %v1293_v59  ;;  %v1415_v16 = vpop.f32.mrb[59].mxu0  ;;  %2478 = vmatpush3.bf16.msra.mxu1 %v2475_v57 }
 0x478   : > { %v2479_v0 = vpack.c.bf16 %v1429_v54, %v1428_v8  ;;  %v1416_v5 = vadd.f32 %v1415_v16, %v1292_v60 }
 0x479   : > { %v1431_v1 = vmax.f32 %v1421_v33, 0.0 }
 0x47a   : > { %v1430_v13 = vmax.f32 %v1416_v5, 0.0  ;;  %2480 = vmatprep.subr.bf16.mxu1 %v2479_v0  ;;  %v1759_v40 = vpop.f32.mrb[60].mxu0 }
 0x47b   : > { %2482 = vmatpush3.bf16.msra.mxu1 %v2479_v0  ;;  %v1761_v31 = vpop.f32.mrb[61].mxu0 }
 0x47c   : > { %v2483_v2 = vpack.c.bf16 %v1431_v1, %v1430_v13 }
 0x47e   : > { %2484 = vmatprep.subr.bf16.mxu1 %v2483_v2  ;;  %v1765_v35 = vpop.f32.mrb[62].mxu0 }
 0x47f   : > { %2486 = vmatpush3.bf16.msra.mxu1 %v2483_v2  ;;  %v1767_v36 = vpop.f32.mrb[63].mxu0 }
 0x482   : > { %2422 = vmatmul.mubr.msk.f32.vlgmr.msra.gmra.mrb[60].mxu1 %vm1294_vm5, %v1433_v22  ;;  %v1771_v49 = vpop.f32.mrb[64].mxu0 }
 0x483   : > { %2424 = vmatprep.mubr.msk.f32.mxu1 %vm1294_vm5, %v1434_v9  ;;  %v1773_v51 = vpop.f32.mrb[65].mxu0 }
 0x486   : > { %2425 = vmatmul.mubr.msk.f32.gmra.mrb[62].mxu1 %vm1294_vm5, %v1435_v10  ;;  %v1777_v52 = vpop.f32.mrb[66].mxu0 }
 0x487   : > { %2435 = vmatprep.mubr.msk.f32.mxu1 %vm837_vm4, %v1538_v11  ;;  %v1779_v55 = vpop.f32.mrb[67].mxu0 }
 0x555   : > { %v2423_v20 = vpop.f32.mrb[60].mxu1 }
 0x556   : > { %v1524_v21 = vadd.f32 %v2423_v20, %v1437_v7  ;;  %v1518_v48 = vpop.f32.mrb[61].mxu1  ;;  %v1871_v7 = vld [vmem:[%s3113_s2 + $0x118] sm:$0xff]  ;;  %v1873_v20 = vld [vmem:[%s3113_s2 + $0x128] sm:$0xff] }
 0x557   : > { %v1519_v23 = vadd.f32 %v1518_v48, %v1436_v4  ;;  %v1872_v4 = vld [vmem:[%s3113_s2 + $0x120] sm:$0xff] }
 0x559   : > { %v3005_v25 = vpack.c.bf16 %v1524_v21, %v1519_v23  ;;  %v2426_v26 = vpop.f32.mrb[62].mxu1  ;;  %v1874_v21 = vld [vmem:[%s3113_s2 + $0x130] sm:$0xff] }
 0x55a   : > { %v1534_v27 = vadd.f32 %v2426_v26, %v1439_v24  ;;  %v1528_v28 = vpop.f32.mrb[63].mxu1  ;;  %v1976_v26 = vld [vmem:[%s3113_s2 + $0x138] sm:$0xff] }
 0x55b   : > { %v1529_v29 = vadd.f32 %v1528_v28, %v1438_v34  ;;  %2488 = vmatprep.subr.bf16.mxu1 %v3005_v25  ;;  %v1875_v28 = vld [vmem:[%s3114_s3 + $0x118] sm:$0xff] }
 0x55c   : > { %2490 = vmatpush3.bf16.msra.mxu1 %v3005_v25 }
 0x55d   : > { %v3009_v30 = vpack.c.bf16 %v1534_v27, %v1529_v29  ;;  %v1876_v27 = vld [vmem:[%s3114_s3 + $0x120] sm:$0xff] }
 0x55e   : > { %v1977_v29 = vld [vmem:[%s3113_s2 + $0x140] sm:$0xff] }
 0x55f   : > { %2492 = vmatprep.subr.bf16.mxu1 %v3009_v30 }
 0x560   : > { %2494 = vmatpush3.bf16.msra.mxu1 %v3009_v30 }
 0x563   : > { %2436 = vmatmul.mubr.msk.f32.vlgmr.msra.gmra.mrb[64].mxu1 %vm837_vm4, %v1539_v50 }
 0x564   : > { %2438 = vmatprep.mubr.msk.f32.mxu1 %vm837_vm4, %v1540_v6 }
 0x567   : > { %2439 = vmatmul.mubr.msk.f32.gmra.mrb[66].mxu1 %vm837_vm4, %v1541_v39 }
 0x568   : > { %1864 = vmatprep.mubr.f32.mxu1 %v2546_v15 }
 0x636   : > { %v2437_v38 = vpop.f32.mrb[64].mxu1 }
 0x637   : > { %v1630_v41 = vadd.f32 %v2437_v38, %v1543_v37  ;;  %v1624_v42 = vpop.f32.mrb[65].mxu1 }
 0x638   : > { %v1625_v44 = vadd.f32 %v1624_v42, %v1542_v46  ;;  %v2117_v42 = vld [vmem:[%s3114_s3 + $0x158] sm:$0x7] }
 0x639   : > { %1654 = vperm.xlu0 %2531, %v1630_v41   ;;  %v1979_v41 = vld [vmem:[%s3113_s2 + $0x150] sm:$0xff] }
 0x63a   : > { %v2440_v43 = vpop.f32.mrb[66].mxu1  ;;  %1649 = vperm.xlu1 %2532, %v1625_v44  }
 0x63b   : > { %v1634_v62 = vpop.f32.mrb[67].mxu1  ;;  %v1640_v53 = vadd.f32 %v2440_v43, %v1545_v32 }
 0x63c   : > { %v1635_v63 = vadd.f32 %v1634_v62, %v1544_v45 }
 0x63d   : > { %1794 = vperm.xlu0 %2531, %v1791_v47  }
 0x63e   : > { %1659 = vperm.xlu1 %2532, %v1635_v63  }
 0x642   : > { %1664 = vperm.xlu1 %2532, %v1640_v53  }
 0x6b8   : > { %v1655_v56 = vpop.permute.xlu0 %1654 }
 0x6b9   : > { %v1766_v57 = vadd.f32 %v1765_v35, %v1655_v56  ;;  %v1768_v58 = vadd.f32 %v1767_v36, %v1655_v56  ;;  %v1650_v59 = vpop.permute.xlu1 %1649  ;;  %v1978_v35 = vld [vmem:[%s3113_s2 + $0x148] sm:$0xff] }
 0x6ba   : > { %v1760_v54 = vadd.f32 %v1759_v40, %v1650_v59  ;;  %v1762_v60 = vadd.f32 %v1761_v31, %v1650_v59  ;;  %v1878_v40 = vld [vmem:[%s3114_s3 + $0x130] sm:$0xff]  ;;  %v1877_v31 = vld [vmem:[%s3114_s3 + $0x128] sm:$0xff] }
 0x6bb   : > { %v1784_v8 = vmax.f32 %v1766_v57, 0.0  ;;  %v1785_v61 = vmax.f32 %v1768_v58, 0.0 }
 0x6bc   : > { %v1782_v33 = vmax.f32 %v1760_v54, 0.0  ;;  %v1783_v16 = vmax.f32 %v1762_v60, 0.0  ;;  %v1795_v23 = vpop.permute.xlu0 %1794 }
 0x6bd   : > { %v1660_v0 = vpop.permute.xlu1 %1659 }
 0x6be   : > { %v2497_v5 = vpack.c.bf16 %v1784_v8, %v1782_v33  ;;  %v2495_v1 = vpack.c.bf16 %v1785_v61, %v1783_v16  ;;  %v1772_v13 = vadd.f32 %v1771_v49, %v1660_v0  ;;  %v1774_v2 = vadd.f32 %v1773_v51, %v1660_v0 }
 0x6c0   : > { %2496 = vmatprep.subr.bf16.mxu1 %v2495_v1  ;;  %v1786_v11 = vmax.f32 %v1772_v13, 0.0  ;;  %v1787_v12 = vmax.f32 %v1774_v2, 0.0 }
 0x6c1   : > { %2498 = vmatpush1.bf16.msra.mxu1 %v2497_v5  ;;  %v1665_v22 = vpop.permute.xlu1 %1664 }
 0x6c2   : > { %v1778_v9 = vadd.f32 %v1777_v52, %v1665_v22  ;;  %v1780_v10 = vadd.f32 %v1779_v55, %v1665_v22 }
 0x6c4   : > { %v1788_v14 = vmax.f32 %v1778_v9, 0.0  ;;  %v1789_v3 = vmax.f32 %v1780_v10, 0.0 }
 0x6c6   : > { %v2501_v17 = vpack.c.bf16 %v1788_v14, %v1786_v11  ;;  %v2499_v18 = vpack.c.bf16 %v1789_v3, %v1787_v12  ;;  %v2116_v12 = vld [vmem:[%s3113_s2 + $0x158] sm:$0x7] }
 0x6c8   : > { %2500 = vmatprep.subr.bf16.mxu1 %v2499_v18 }
 0x6c9   : > { %2502 = vmatpush1.bf16.msra.mxu1 %v2501_v17 }
 0x6ca   : > { %2504 = vmatprep.subr.bf16.mxu1 %v3005_v25 }
 0x6cc   : > { %2317 = vmatmul.mubr.msk.f32.vlgmr.msra.gmra.mrb[68].mxu1 %vm837_vm4, %v1790_v19 }
 0x6cd   : > { %2506 = vmatpush3.bf16.msra.mxu1 %v3005_v25  ;;  %2449 = vmatprep.mubr.msk.f32.mxu1 %vm837_vm4, %v1871_v7 }
 0x6ce   : > { %2508 = vmatprep.subr.bf16.mxu1 %v3009_v30 }
 0x6d1   : > { %2510 = vmatpush3.bf16.msra.mxu1 %v3009_v30 }
 0x6d4   : > { %2450 = vmatmul.mubr.msk.f32.vlgmr.msra.gmra.mrb[70].mxu1 %vm837_vm4, %v1872_v4 }
 0x6d5   : > { %2452 = vmatprep.mubr.msk.f32.mxu1 %vm837_vm4, %v1873_v20 }
 0x6d8   : > { %2453 = vmatmul.mubr.msk.f32.gmra.mrb[72].mxu1 %vm837_vm4, %v1874_v21 }
 0x6d9   : > { %2190 = vmatprep.mubr.f32.mxu1 %v2546_v15 }
 0x79f   : > { %v1866_v48 = vpop.f32.mrb[68].mxu1 }
 0x7a0   : > { %v1868_v24 = vpop.f32.mrb[69].mxu1  ;;  %v1867_v25 = vadd.f32 %v1866_v48, %v1795_v23 }
 0x7a1   : > { %v1869_v34 = vadd.f32 %v1868_v24, %v1795_v23 }
 0x7a3   : > { %2322 = vmatprep.subr.msk.mxu0 %vm2012_vm7, %v1869_v34 }
 0x7a4   : > { %2323 = vmatpush1.msk.msra.mxu0 %vm2012_vm7, %v1867_v25 }
 0x7a5   : > { %2324 = vmatmul.mubr.msk.f32.vlgmr.msra.gmra.mrb[68].mxu0 %vm252_vm2, %v1976_v26 }
 0x7a6   : > { %2089 = vmatprep.mubr.f32.mxu0 %v2546_v15 }
 0x7a7   : > { %v2451_v30 = vpop.f32.mrb[70].mxu1 }
 0x7a8   : > { %v1963_v50 = vadd.f32 %v2451_v30, %v1876_v27  ;;  %v1957_v6 = vpop.f32.mrb[71].mxu1 }
 0x7a9   : > { %v1958_v39 = vadd.f32 %v1957_v6, %v1875_v28  ;;  %2325 = vmatmul.mubr.msk.f32.gmra.mrb[70].mxu0 %vm252_vm2, %v1977_v29 }
 0x7aa   : > { %1987 = vperm.xlu0 %2531, %v1963_v50   ;;  %2095 = vmatprep.mubr.f32.mxu0 %v2546_v15 }
 0x7ab   : > { %v2454_v36 = vpop.f32.mrb[72].mxu1  ;;  %1982 = vperm.xlu1 %2532, %v1958_v39  }
 0x7ac   : > { %v1973_v37 = vadd.f32 %v2454_v36, %v1878_v40  ;;  %v1967_v46 = vpop.f32.mrb[73].mxu1 }
 0x7ad   : > { %v1968_v38 = vadd.f32 %v1967_v46, %v1877_v31  ;;  %2326 = vmatmul.mubr.msk.f32.gmra.mrb[72].mxu0 %vm252_vm2, %v1978_v35 }
 0x7ae   : > { %1997 = vperm.xlu0 %2531, %v1973_v37   ;;  %2101 = vmatprep.mubr.f32.mxu0 %v2546_v15 }
 0x7af   : > { %1992 = vperm.xlu1 %2532, %v1968_v38  }
 0x7b1   : > { %2327 = vmatmul.mubr.msk.f32.gmra.mrb[74].mxu0 %vm252_vm2, %v1979_v41 }
 0x7b3   : > { %2120 = vperm.xlu1 %2532, %v2117_v42  }
 0x829   : > { %v1988_v62 = vpop.permute.xlu0 %1987 }
 0x82a   : > { %v1983_v43 = vpop.permute.xlu1 %1982 }
 0x82d   : > { %v1998_v61 = vpop.permute.xlu0 %1997 }
 0x82e   : > { %v1993_v54 = vpop.permute.xlu1 %1992 }
 0x832   : > { %v2121_v14 = vpop.permute.xlu1 %2120 }
 0x878   : > { %v2085_v44 = vpop.f32.mrb[68].mxu0 }
 0x879   : > { %v2087_v45 = vpop.f32.mrb[69].mxu0  ;;  %v2086_v47 = vadd.f32 %v2085_v44, %v1983_v43 }
 0x87a   : > { %v2088_v49 = vadd.f32 %v2087_v45, %v1983_v43 }
 0x87b   : > { %v2108_v52 = vmax.f32 %v2086_v47, 0.0 }
 0x87c   : > { %v2091_v63 = vpop.f32.mrb[70].mxu0  ;;  %v2109_v55 = vmax.f32 %v2088_v49, 0.0 }
 0x87d   : > { %v2092_v15 = vadd.f32 %v2091_v63, %v1988_v62  ;;  %v2093_v51 = vpop.f32.mrb[71].mxu0 }
 0x87e   : > { %v2094_v32 = vadd.f32 %v2093_v51, %v1988_v62 }
 0x87f   : > { %v2110_v53 = vmax.f32 %v2092_v15, 0.0 }
 0x880   : > { %v2111_v56 = vmax.f32 %v2094_v32, 0.0  ;;  %v2097_v57 = vpop.f32.mrb[72].mxu0 }
 0x881   : > { %v2513_v58 = vpack.c.bf16 %v2110_v53, %v2108_v52  ;;  %v2099_v59 = vpop.f32.mrb[73].mxu0  ;;  %v2098_v8 = vadd.f32 %v2097_v57, %v1993_v54 }
 0x882   : > { %v2511_v60 = vpack.c.bf16 %v2111_v56, %v2109_v55  ;;  %v2100_v33 = vadd.f32 %v2099_v59, %v1993_v54 }
 0x883   : > { %v2112_v13 = vmax.f32 %v2098_v8, 0.0 }
 0x884   : > { %v2103_v16 = vpop.f32.mrb[74].mxu0  ;;  %2512 = vmatprep.subr.bf16.mxu1 %v2511_v60  ;;  %v2113_v22 = vmax.f32 %v2100_v33, 0.0 }
 0x885   : > { %v2104_v0 = vadd.f32 %v2103_v16, %v1998_v61  ;;  %v2105_v5 = vpop.f32.mrb[75].mxu0  ;;  %2514 = vmatpush1.bf16.msra.mxu1 %v2513_v58 }
 0x886   : > { %v2106_v1 = vadd.f32 %v2105_v5, %v1998_v61 }
 0x887   : > { %v2114_v2 = vmax.f32 %v2104_v0, 0.0 }
 0x888   : > { %v2115_v9 = vmax.f32 %v2106_v1, 0.0 }
 0x889   : > { %v2517_v10 = vpack.c.bf16 %v2114_v2, %v2112_v13 }
 0x88a   : > { %v2515_v11 = vpack.c.bf16 %v2115_v9, %v2113_v22 }
 0x88c   : > { %2516 = vmatprep.subr.bf16.mxu1 %v2515_v11 }
 0x88d   : > { %2518 = vmatpush1.bf16.msra.mxu1 %v2517_v10 }
 0x890   : > { %2328 = vmatmul.mubr.msk.f32.vlgmr.msra.gmra.mrb[74].mxu1 %vm837_vm4, %v2116_v12 }
 0x963   : > { %v2192_v3 = vpop.f32.mrb[74].mxu1 }
 0x964   : > { %v2193_v17 = vadd.f32 %v2192_v3, %v2121_v14  ;;  %v2194_v18 = vpop.f32.mrb[75].mxu1 }
 0x965   : > { %v2195_v19 = vadd.f32 %v2194_v18, %v2121_v14 }
 0x967   : > { %v2199_v7 = vcombine.low %v2193_v17, %v2195_v19 }
 0x969   : > { %2201 = vst [vmem:[%s197_s18] sm:$0x77] %v2199_v7 }
 0x96a PF: > { %s14_s15 = sadd.s32 1, %s2541_s15  }
 0x96b   : > { %p11_p4 = scmp.ge.s32.totalorder %s14_s15, 4  }
 0x96d   :  { %13 = sbr.rel (!%p11_p4) target bundleno = 1 (0x1), region = 66 }

</bundles_post_ra>
